<compile_context>
chip_gen: v5e
topology: v5e:2x2
jax: 0.10.0
libtpu: 0.0.40
codegen_flags: <defaults>
</compile_context>

<pallas_src>
import jax
import jax.numpy as jnp
from jax.experimental import pallas as pl
from jax.experimental.pallas import tpu as pltpu


LANE = 128          # lane width (in-register / VMEM padding granularity)
TILE_R = 1024       # target row tile (multiple of 16: bf16 packed sublanes)
_EPS = 1e-5         # nn.BatchNorm2d default eps


def _round_up(x, m):
    return (x + m - 1) // m * m


def _vmem_limit_bytes(tile_r, k, cout):
    """~2x the double-buffered per-step working set (VMEM pads lanes to 128)."""
    lanes = lambda c: _round_up(max(c, 1), LANE)
    work = 2 * tile_r * (2 * lanes(k) + (2 + 2 + 4) * lanes(cout))   # patches + y(in/out) + f32 out
    work += 1 << 20                                                  # weight / scale / stats slack
    return int(min(max(2 * work, 8 << 20), 48 << 20))


# ---------------------------------------------------------------------------
# Kernels
# ---------------------------------------------------------------------------
def conv_stats_kernel(p_ref, w_ref, y_ref, s1_ref, s2_ref):
    """Per row tile: conv-as-matmul + per-tile BN partial sums.

    p_ref  : (tile_r, K)    bf16  im2col patches (K = 9*Cin, unpadded)
    w_ref  : (K, Cout)      bf16  folded conv weight (unpadded)
    y_ref  : (tile_r, Cout) bf16  raw conv output (bf16 inter-pass stream)
    s1_ref : (8, Cout)      f32   sum(y)   replicated over 8 sublanes
    s2_ref : (8, Cout)      f32   sum(y*y) replicated over 8 sublanes
    """
    acc = jnp.dot(p_ref[...], w_ref[...], preferred_element_type=jnp.float32)
    y_ref[...] = acc.astype(y_ref.dtype)
    co = acc.shape[1]
    # Cross-sublane reductions on the XLU; MXU stays free for the main matmul.
    s1 = jnp.sum(acc, axis=0, keepdims=True)
    s2 = jnp.sum(acc * acc, axis=0, keepdims=True)
    s1_ref[...] = jnp.broadcast_to(s1, (8, co))
    s2_ref[...] = jnp.broadcast_to(s2, (8, co))


def bn_relu_kernel(y_ref, scale_ref, shift_ref, o_ref):
    """Per row tile: folded BatchNorm (scale/shift) + ReLU.

    y_ref: (tile_r, Cout) bf16; scale/shift: (1, Cout) f32; o_ref: (tile_r, Cout).
    """
    y = y_ref[...].astype(jnp.float32) * scale_ref[...] + shift_ref[...]
    o_ref[...] = jnp.maximum(y, 0.0).astype(o_ref.dtype)


# ---------------------------------------------------------------------------
# Wrapper glue
# ---------------------------------------------------------------------------
def _im2col_d2(x_nhwc):
    """im2col for a 3x3 conv with dilation=2, padding=2 -> (N*H*W, 9*C).

    Input is already bf16 so the 9-tap materialization moves half the bytes.
    """
    N, H, W, C = x_nhwc.shape
    xp = jnp.pad(x_nhwc, ((0, 0), (2, 2), (2, 2), (0, 0)))
    taps = [xp[:, 2 * ky:2 * ky + H, 2 * kx:2 * kx + W, :]
            for ky in range(3) for kx in range(3)]
    p = jnp.stack(taps, axis=3)            # (N, H, W, 9, C) — tap-major, then channel
    return p.reshape(N * H * W, 9 * C)


def _conv_bn_relu_stage(x_nhwc, w_hwio, gamma, beta, out_dtype):
    """One (dilated conv -> BN(train) -> ReLU) stage on an NHWC tensor."""
    N, H, W, Cin = x_nhwc.shape
    Cout = w_hwio.shape[-1]
    R = N * H * W
    K = 9 * Cin

    # Big row tile (near HBM roofline), multiple of 16, capped at ceil(R/2) so the
    # single "parallel" grid axis has >= 2 tiles (v7x: both TensorCores busy).
    tile_r = min(TILE_R, max(16, _round_up(pl.cdiv(R, 2), 16)))
    Rp = _round_up(R, tile_r)
    nt = Rp // tile_r

    # bf16 cast BEFORE im2col; only the row dim is zero-padded (K, Cout stay exact).
    patches = jnp.pad(_im2col_d2(x_nhwc.astype(jnp.bfloat16)),
                      ((0, Rp - R), (0, 0)))
    w2d = w_hwio.reshape(K, Cout).astype(jnp.bfloat16)

    vmem_limit = _vmem_limit_bytes(tile_r, K, Cout)

    # --- pass 1: conv matmul + per-tile BN partial sums ----------------------
    y_conv, st1, st2 = pl.pallas_call(
        conv_stats_kernel,
        out_shape=[jax.ShapeDtypeStruct((Rp, Cout), jnp.bfloat16),
                   jax.ShapeDtypeStruct((nt * 8, Cout), jnp.float32),
                   jax.ShapeDtypeStruct((nt * 8, Cout), jnp.float32)],
        grid_spec=pltpu.PrefetchScalarGridSpec(
            num_scalar_prefetch=0,
            grid=(nt,),
            in_specs=[pl.BlockSpec((tile_r, K), lambda i: (i, 0)),
                      pl.BlockSpec((K, Cout), lambda i: (0, 0))],
            out_specs=[pl.BlockSpec((tile_r, Cout), lambda i: (i, 0)),
                       pl.BlockSpec((8, Cout), lambda i: (i, 0)),
                       pl.BlockSpec((8, Cout), lambda i: (i, 0))]),
        compiler_params=pltpu.CompilerParams(
            dimension_semantics=("parallel",),
            vmem_limit_bytes=vmem_limit),
    )(patches, w2d)

    # --- tiny global-stat finalization + BN fold (wrapper glue, all f32) -----
    # Padded rows contribute exactly 0 to the sums, so dividing by R is exact.
    # NOTE: one-pass E[y^2]-E[y]^2 in f32; fine here (zero-mean conv outputs), would
    # need a shifted/Welford form if |mean| >> std.
    s1 = jnp.sum(st1.reshape(nt, 8, Cout)[:, 0, :], axis=0)
    s2 = jnp.sum(st2.reshape(nt, 8, Cout)[:, 0, :], axis=0)
    r = jnp.float32(R)
    mean = s1 / r
    var = jnp.maximum(s2 / r - mean * mean, 0.0)     # biased var (training-mode BN)
    scale = gamma.astype(jnp.float32) * jax.lax.rsqrt(var + _EPS)
    shift = beta.astype(jnp.float32) - mean * scale

    # --- pass 2: folded BN + ReLU --------------------------------------------
    y = pl.pallas_call(
        bn_relu_kernel,
        out_shape=jax.ShapeDtypeStruct((Rp, Cout), out_dtype),
        grid_spec=pltpu.PrefetchScalarGridSpec(
            num_scalar_prefetch=0,
            grid=(nt,),
            in_specs=[pl.BlockSpec((tile_r, Cout), lambda i: (i, 0)),
                      pl.BlockSpec((1, Cout), lambda i: (0, 0)),
                      pl.BlockSpec((1, Cout), lambda i: (0, 0))],
            out_specs=pl.BlockSpec((tile_r, Cout), lambda i: (i, 0))),
        compiler_params=pltpu.CompilerParams(
            dimension_semantics=("parallel",),
            vmem_limit_bytes=vmem_limit),
    )(y_conv, scale.reshape(1, Cout), shift.reshape(1, Cout))

    return y[:R].reshape(N, H, W, Cout)


def bottleneck_forward(x_nchw, params):
    """Bottleneck forward: (N, Cin, H, W) f32 -> (N, Cout, H, W) f32.

    Conv biases (params['b1'], params['b2']) are accepted but unused: with
    training-mode BatchNorm a per-channel constant bias is exactly cancelled by
    the batch-mean subtraction, so dropping it does not change the output.
    """
    x = jnp.transpose(x_nchw, (0, 2, 3, 1))          # NCHW -> NHWC
    # Stage-1 activation kept in bf16: it only feeds the next bf16 MXU matmul.
    h = _conv_bn_relu_stage(x, params["w1"], params["g1"], params["be1"],
                            jnp.bfloat16)
    h = _conv_bn_relu_stage(h, params["w2"], params["g2"], params["be2"],
                            jnp.float32)
    return jnp.transpose(h, (0, 3, 1, 2))            # NHWC -> NCHW


# ---------------------------------------------------------------------------
# Pure-JAX f32 reference (correctness check only)
# ---------------------------------------------------------------------------
def _ref_stage(x_nhwc, w, b, gamma, beta):
    y = jax.lax.conv_general_dilated(
        x_nhwc, w,
        window_strides=(1, 1),
        padding=((2, 2), (2, 2)),
        rhs_dilation=(2, 2),
        dimension_numbers=("NHWC", "HWIO", "NHWC"),
    ) + b
    mean = jnp.mean(y, axis=(0, 1, 2), keepdims=True)
    var = jnp.mean((y - mean) ** 2, axis=(0, 1, 2), keepdims=True)
    y = (y - mean) / jnp.sqrt(var + _EPS) * gamma + beta
    return jnp.maximum(y, 0.0)


def _ref_forward(x_nchw, p):
    x = jnp.transpose(x_nchw, (0, 2, 3, 1))
    h = _ref_stage(x, p["w1"], p["b1"], p["g1"], p["be1"])
    h = _ref_stage(h, p["w2"], p["b2"], p["g2"], p["be2"])
    return jnp.transpose(h, (0, 3, 1, 2))


if __name__ == "__main__":
    key = jax.random.PRNGKey(0)
    N, Cin, Cout, H, W = 2, 4, 8, 16, 16

    keys = jax.random.split(key, 9)
    x = jax.random.normal(keys[0], (N, Cin, H, W), jnp.float32)

    # Conv weights stored HWIO (PyTorch OIHW -> transpose(2,3,1,0) would convert).
    params = {
        "w1": 0.1 * jax.random.normal(keys[1], (3, 3, Cin, Cout), jnp.float32),
        "b1": 0.1 * jax.random.normal(keys[2], (Cout,), jnp.float32),
        "g1": 1.0 + 0.1 * jax.random.normal(keys[3], (Cout,), jnp.float32),
        "be1": 0.1 * jax.random.normal(keys[4], (Cout,), jnp.float32),
        "w2": 0.1 * jax.random.normal(keys[5], (3, 3, Cout, Cout), jnp.float32),
        "b2": 0.1 * jax.random.normal(keys[6], (Cout,), jnp.float32),
        "g2": 1.0 + 0.1 * jax.random.normal(keys[7], (Cout,), jnp.float32),
        "be2": 0.1 * jax.random.normal(keys[8], (Cout,), jnp.float32),
    }

    fwd = jax.jit(bottleneck_forward)
    out = jax.block_until_ready(fwd(x, params))
    ref = jax.block_until_ready(_ref_forward(x, params))

    assert out.shape == (N, Cout, H, W), out.shape
    err = float(jnp.max(jnp.abs(out - ref)))
    # bf16 MXU inputs + bf16 inter-pass activations through two BN normalizations give
    # ~1-3e-2 max-abs error vs the pure-f32 reference; semantic/layout bugs would be O(1).
    assert err < 1e-1, err
    print("KERNEL_OK")
</pallas_src>

<mosaic_0001>
module attributes {stable_mosaic.version = 11 : i64} {
  func.func @conv_stats_kernel(%arg0: i32, %arg1: memref<256x36xbf16, #tpu.memory_space<vmem>>, %arg2: memref<36x8xbf16, #tpu.memory_space<vmem>>, %arg3: memref<256x8xbf16, #tpu.memory_space<vmem>>, %arg4: memref<8x8xf32, #tpu.memory_space<vmem>>, %arg5: memref<8x8xf32, #tpu.memory_space<vmem>>) attributes {dimension_semantics = [#tpu.dimension_semantics<parallel>], iteration_bounds = array<i64: 2>, scalar_prefetch = 0 : i64, scratch_operands = 0 : i64, tpu.core_type = #tpu.core_type<tc>, window_params = [{transform_indices = @transform_0, window_bounds = array<i64: 256, 36>}, {pipeline_mode = #tpu.pipeline_mode<synchronous>, transform_indices = @transform_1, window_bounds = array<i64: 36, 8>}, {transform_indices = @transform_2, window_bounds = array<i64: 256, 8>}, {transform_indices = @transform_3, window_bounds = array<i64: 8, 8>}, {transform_indices = @transform_4, window_bounds = array<i64: 8, 8>}]} {
    %c0 = arith.constant 0 : index
    %c0_0 = arith.constant 0 : index
    %0 = vector.load %arg1[%c0, %c0_0] : memref<256x36xbf16, #tpu.memory_space<vmem>>, vector<256x36xbf16>
    %c0_1 = arith.constant 0 : index
    %c0_2 = arith.constant 0 : index
    %1 = vector.load %arg2[%c0_1, %c0_2] : memref<36x8xbf16, #tpu.memory_space<vmem>>, vector<36x8xbf16>
    %cst = arith.constant dense<0.000000e+00> : vector<256x8xf32>
    %2 = tpu.matmul %0, %1, %cst {dimension_numbers = #tpu.dot_dimension_numbers<[1], [0], [0], [1], [0, 0, 1, 1], [], []>} : vector<256x36xbf16>, vector<36x8xbf16>, vector<256x8xf32> -> vector<256x8xf32>
    %3 = arith.truncf %2 : vector<256x8xf32> to vector<256x8xbf16>
    %c0_3 = arith.constant 0 : index
    %c0_4 = arith.constant 0 : index
    %4 = vector.load %arg3[%c0_3, %c0_4] : memref<256x8xbf16, #tpu.memory_space<vmem>>, vector<256x8xbf16>
    tpu.vector_store %arg3[%c0_3, %c0_4], %3 {strides = array<i32>} : memref<256x8xbf16, #tpu.memory_space<vmem>>, vector<256x8xbf16>,
    %cst_5 = arith.constant dense<0.000000e+00> : vector<8xf32>
    %5 = vector.multi_reduction <add>, %2, %cst_5 [0] : vector<256x8xf32> to vector<8xf32>
    %6 = vector.shape_cast %5 : vector<8xf32> to vector<1x8xf32>
    %7 = arith.mulf %2, %2 : vector<256x8xf32>
    %cst_6 = arith.constant dense<0.000000e+00> : vector<8xf32>
    %8 = vector.multi_reduction <add>, %7, %cst_6 [0] : vector<256x8xf32> to vector<8xf32>
    %9 = vector.shape_cast %8 : vector<8xf32> to vector<1x8xf32>
    %10 = vector.shape_cast %6 : vector<1x8xf32> to vector<1x8xf32>
    %11 = vector.broadcast %10 : vector<1x8xf32> to vector<8x8xf32>
    %c0_7 = arith.constant 0 : index
    %c0_8 = arith.constant 0 : index
    %12 = vector.load %arg4[%c0_7, %c0_8] : memref<8x8xf32, #tpu.memory_space<vmem>>, vector<8x8xf32>
    tpu.vector_store %arg4[%c0_7, %c0_8], %11 {strides = array<i32>} : memref<8x8xf32, #tpu.memory_space<vmem>>, vector<8x8xf32>,
    %13 = vector.shape_cast %9 : vector<1x8xf32> to vector<1x8xf32>
    %14 = vector.broadcast %13 : vector<1x8xf32> to vector<8x8xf32>
    %c0_9 = arith.constant 0 : index
    %c0_10 = arith.constant 0 : index
    %15 = vector.load %arg5[%c0_9, %c0_10] : memref<8x8xf32, #tpu.memory_space<vmem>>, vector<8x8xf32>
    tpu.vector_store %arg5[%c0_9, %c0_10], %14 {strides = array<i32>} : memref<8x8xf32, #tpu.memory_space<vmem>>, vector<8x8xf32>,
    return
  }
  func.func @transform_0(%arg0: i32) -> (i32, i32) {
    %c0_i32 = arith.constant 0 : i32
    %c0_i32_0 = arith.constant 0 : i32
    return %arg0, %c0_i32 : i32, i32
  }
  func.func @transform_1(%arg0: i32) -> (i32, i32) {
    %c0_i32 = arith.constant 0 : i32
    %c0_i32_0 = arith.constant 0 : i32
    %c0_i32_1 = arith.constant 0 : i32
    return %c0_i32, %c0_i32_0 : i32, i32
  }
  func.func @transform_2(%arg0: i32) -> (i32, i32) {
    %c0_i32 = arith.constant 0 : i32
    %c0_i32_0 = arith.constant 0 : i32
    return %arg0, %c0_i32 : i32, i32
  }
  func.func @transform_3(%arg0: i32) -> (i32, i32) {
    %c0_i32 = arith.constant 0 : i32
    %c0_i32_0 = arith.constant 0 : i32
    return %arg0, %c0_i32 : i32, i32
  }
  func.func @transform_4(%arg0: i32) -> (i32, i32) {
    %c0_i32 = arith.constant 0 : i32
    %c0_i32_0 = arith.constant 0 : i32
    return %arg0, %c0_i32 : i32, i32
  }
}

module attributes {stable_mosaic.version = 11 : i64} {
  func.func @bn_relu_kernel(%arg0: i32, %arg1: memref<256x8xbf16, #tpu.memory_space<vmem>>, %arg2: memref<1x8xf32, #tpu.memory_space<vmem>>, %arg3: memref<1x8xf32, #tpu.memory_space<vmem>>, %arg4: memref<256x8xbf16, #tpu.memory_space<vmem>>) attributes {dimension_semantics = [#tpu.dimension_semantics<parallel>], iteration_bounds = array<i64: 2>, scalar_prefetch = 0 : i64, scratch_operands = 0 : i64, tpu.core_type = #tpu.core_type<tc>, window_params = [{transform_indices = @transform_0, window_bounds = array<i64: 256, 8>}, {pipeline_mode = #tpu.pipeline_mode<synchronous>, transform_indices = @transform_1, window_bounds = array<i64: 1, 8>}, {pipeline_mode = #tpu.pipeline_mode<synchronous>, transform_indices = @transform_2, window_bounds = array<i64: 1, 8>}, {transform_indices = @transform_3, window_bounds = array<i64: 256, 8>}]} {
    %c0 = arith.constant 0 : index
    %c0_0 = arith.constant 0 : index
    %0 = vector.load %arg1[%c0, %c0_0] : memref<256x8xbf16, #tpu.memory_space<vmem>>, vector<256x8xbf16>
    %1 = arith.extf %0 : vector<256x8xbf16> to vector<256x8xf32>
    %c0_1 = arith.constant 0 : index
    %c0_2 = arith.constant 0 : index
    %2 = vector.load %arg2[%c0_1, %c0_2] : memref<1x8xf32, #tpu.memory_space<vmem>>, vector<1x8xf32>
    %3 = vector.broadcast %2 : vector<1x8xf32> to vector<256x8xf32>
    %4 = arith.mulf %1, %3 : vector<256x8xf32>
    %c0_3 = arith.constant 0 : index
    %c0_4 = arith.constant 0 : index
    %5 = vector.load %arg3[%c0_3, %c0_4] : memref<1x8xf32, #tpu.memory_space<vmem>>, vector<1x8xf32>
    %6 = vector.broadcast %5 : vector<1x8xf32> to vector<256x8xf32>
    %7 = arith.addf %4, %6 : vector<256x8xf32>
    %cst = arith.constant 0.000000e+00 : f32
    %8 = vector.broadcast %cst : f32 to vector<256x8xf32>
    %9 = arith.maximumf %7, %8 : vector<256x8xf32>
    %10 = arith.truncf %9 : vector<256x8xf32> to vector<256x8xbf16>
    %c0_5 = arith.constant 0 : index
    %c0_6 = arith.constant 0 : index
    %11 = vector.load %arg4[%c0_5, %c0_6] : memref<256x8xbf16, #tpu.memory_space<vmem>>, vector<256x8xbf16>
    tpu.vector_store %arg4[%c0_5, %c0_6], %10 {strides = array<i32>} : memref<256x8xbf16, #tpu.memory_space<vmem>>, vector<256x8xbf16>,
    return
  }
  func.func @transform_0(%arg0: i32) -> (i32, i32) {
    %c0_i32 = arith.constant 0 : i32
    %c0_i32_0 = arith.constant 0 : i32
    return %arg0, %c0_i32 : i32, i32
  }
  func.func @transform_1(%arg0: i32) -> (i32, i32) {
    %c0_i32 = arith.constant 0 : i32
    %c0_i32_0 = arith.constant 0 : i32
    %c0_i32_1 = arith.constant 0 : i32
    return %c0_i32, %c0_i32_0 : i32, i32
  }
  func.func @transform_2(%arg0: i32) -> (i32, i32) {
    %c0_i32 = arith.constant 0 : i32
    %c0_i32_0 = arith.constant 0 : i32
    %c0_i32_1 = arith.constant 0 : i32
    return %c0_i32, %c0_i32_0 : i32, i32
  }
  func.func @transform_3(%arg0: i32) -> (i32, i32) {
    %c0_i32 = arith.constant 0 : i32
    %c0_i32_0 = arith.constant 0 : i32
    return %arg0, %c0_i32 : i32, i32
  }
}

module attributes {stable_mosaic.version = 11 : i64} {
  func.func @bn_relu_kernel(%arg0: i32, %arg1: memref<256x8xbf16, #tpu.memory_space<vmem>>, %arg2: memref<1x8xf32, #tpu.memory_space<vmem>>, %arg3: memref<1x8xf32, #tpu.memory_space<vmem>>, %arg4: memref<256x8xf32, #tpu.memory_space<vmem>>) attributes {dimension_semantics = [#tpu.dimension_semantics<parallel>], iteration_bounds = array<i64: 2>, scalar_prefetch = 0 : i64, scratch_operands = 0 : i64, tpu.core_type = #tpu.core_type<tc>, window_params = [{transform_indices = @transform_0, window_bounds = array<i64: 256, 8>}, {pipeline_mode = #tpu.pipeline_mode<synchronous>, transform_indices = @transform_1, window_bounds = array<i64: 1, 8>}, {pipeline_mode = #tpu.pipeline_mode<synchronous>, transform_indices = @transform_2, window_bounds = array<i64: 1, 8>}, {transform_indices = @transform_3, window_bounds = array<i64: 256, 8>}]} {
    %c0 = arith.constant 0 : index
    %c0_0 = arith.constant 0 : index
    %0 = vector.load %arg1[%c0, %c0_0] : memref<256x8xbf16, #tpu.memory_space<vmem>>, vector<256x8xbf16>
    %1 = arith.extf %0 : vector<256x8xbf16> to vector<256x8xf32>
    %c0_1 = arith.constant 0 : index
    %c0_2 = arith.constant 0 : index
    %2 = vector.load %arg2[%c0_1, %c0_2] : memref<1x8xf32, #tpu.memory_space<vmem>>, vector<1x8xf32>
    %3 = vector.broadcast %2 : vector<1x8xf32> to vector<256x8xf32>
    %4 = arith.mulf %1, %3 : vector<256x8xf32>
    %c0_3 = arith.constant 0 : index
    %c0_4 = arith.constant 0 : index
    %5 = vector.load %arg3[%c0_3, %c0_4] : memref<1x8xf32, #tpu.memory_space<vmem>>, vector<1x8xf32>
    %6 = vector.broadcast %5 : vector<1x8xf32> to vector<256x8xf32>
    %7 = arith.addf %4, %6 : vector<256x8xf32>
    %cst = arith.constant 0.000000e+00 : f32
    %8 = vector.broadcast %cst : f32 to vector<256x8xf32>
    %9 = arith.maximumf %7, %8 : vector<256x8xf32>
    %c0_5 = arith.constant 0 : index
    %c0_6 = arith.constant 0 : index
    %10 = vector.load %arg4[%c0_5, %c0_6] : memref<256x8xf32, #tpu.memory_space<vmem>>, vector<256x8xf32>
    tpu.vector_store %arg4[%c0_5, %c0_6], %9 {strides = array<i32>} : memref<256x8xf32, #tpu.memory_space<vmem>>, vector<256x8xf32>,
    return
  }
  func.func @transform_0(%arg0: i32) -> (i32, i32) {
    %c0_i32 = arith.constant 0 : i32
    %c0_i32_0 = arith.constant 0 : i32
    return %arg0, %c0_i32 : i32, i32
  }
  func.func @transform_1(%arg0: i32) -> (i32, i32) {
    %c0_i32 = arith.constant 0 : i32
    %c0_i32_0 = arith.constant 0 : i32
    %c0_i32_1 = arith.constant 0 : i32
    return %c0_i32, %c0_i32_0 : i32, i32
  }
  func.func @transform_2(%arg0: i32) -> (i32, i32) {
    %c0_i32 = arith.constant 0 : i32
    %c0_i32_0 = arith.constant 0 : i32
    %c0_i32_1 = arith.constant 0 : i32
    return %c0_i32, %c0_i32_0 : i32, i32
  }
  func.func @transform_3(%arg0: i32) -> (i32, i32) {
    %c0_i32 = arith.constant 0 : i32
    %c0_i32_0 = arith.constant 0 : i32
    return %arg0, %c0_i32 : i32, i32
  }
}

module attributes {stable_mosaic.version = 11 : i64} {
  func.func @conv_stats_kernel(%arg0: i32, %arg1: memref<256x72xbf16, #tpu.memory_space<vmem>>, %arg2: memref<72x8xbf16, #tpu.memory_space<vmem>>, %arg3: memref<256x8xbf16, #tpu.memory_space<vmem>>, %arg4: memref<8x8xf32, #tpu.memory_space<vmem>>, %arg5: memref<8x8xf32, #tpu.memory_space<vmem>>) attributes {dimension_semantics = [#tpu.dimension_semantics<parallel>], iteration_bounds = array<i64: 2>, scalar_prefetch = 0 : i64, scratch_operands = 0 : i64, tpu.core_type = #tpu.core_type<tc>, window_params = [{transform_indices = @transform_0, window_bounds = array<i64: 256, 72>}, {pipeline_mode = #tpu.pipeline_mode<synchronous>, transform_indices = @transform_1, window_bounds = array<i64: 72, 8>}, {transform_indices = @transform_2, window_bounds = array<i64: 256, 8>}, {transform_indices = @transform_3, window_bounds = array<i64: 8, 8>}, {transform_indices = @transform_4, window_bounds = array<i64: 8, 8>}]} {
    %c0 = arith.constant 0 : index
    %c0_0 = arith.constant 0 : index
    %0 = vector.load %arg1[%c0, %c0_0] : memref<256x72xbf16, #tpu.memory_space<vmem>>, vector<256x72xbf16>
    %c0_1 = arith.constant 0 : index
    %c0_2 = arith.constant 0 : index
    %1 = vector.load %arg2[%c0_1, %c0_2] : memref<72x8xbf16, #tpu.memory_space<vmem>>, vector<72x8xbf16>
    %cst = arith.constant dense<0.000000e+00> : vector<256x8xf32>
    %2 = tpu.matmul %0, %1, %cst {dimension_numbers = #tpu.dot_dimension_numbers<[1], [0], [0], [1], [0, 0, 1, 1], [], []>} : vector<256x72xbf16>, vector<72x8xbf16>, vector<256x8xf32> -> vector<256x8xf32>
    %3 = arith.truncf %2 : vector<256x8xf32> to vector<256x8xbf16>
    %c0_3 = arith.constant 0 : index
    %c0_4 = arith.constant 0 : index
    %4 = vector.load %arg3[%c0_3, %c0_4] : memref<256x8xbf16, #tpu.memory_space<vmem>>, vector<256x8xbf16>
    tpu.vector_store %arg3[%c0_3, %c0_4], %3 {strides = array<i32>} : memref<256x8xbf16, #tpu.memory_space<vmem>>, vector<256x8xbf16>,
    %cst_5 = arith.constant dense<0.000000e+00> : vector<8xf32>
    %5 = vector.multi_reduction <add>, %2, %cst_5 [0] : vector<256x8xf32> to vector<8xf32>
    %6 = vector.shape_cast %5 : vector<8xf32> to vector<1x8xf32>
    %7 = arith.mulf %2, %2 : vector<256x8xf32>
    %cst_6 = arith.constant dense<0.000000e+00> : vector<8xf32>
    %8 = vector.multi_reduction <add>, %7, %cst_6 [0] : vector<256x8xf32> to vector<8xf32>
    %9 = vector.shape_cast %8 : vector<8xf32> to vector<1x8xf32>
    %10 = vector.shape_cast %6 : vector<1x8xf32> to vector<1x8xf32>
    %11 = vector.broadcast %10 : vector<1x8xf32> to vector<8x8xf32>
    %c0_7 = arith.constant 0 : index
    %c0_8 = arith.constant 0 : index
    %12 = vector.load %arg4[%c0_7, %c0_8] : memref<8x8xf32, #tpu.memory_space<vmem>>, vector<8x8xf32>
    tpu.vector_store %arg4[%c0_7, %c0_8], %11 {strides = array<i32>} : memref<8x8xf32, #tpu.memory_space<vmem>>, vector<8x8xf32>,
    %13 = vector.shape_cast %9 : vector<1x8xf32> to vector<1x8xf32>
    %14 = vector.broadcast %13 : vector<1x8xf32> to vector<8x8xf32>
    %c0_9 = arith.constant 0 : index
    %c0_10 = arith.constant 0 : index
    %15 = vector.load %arg5[%c0_9, %c0_10] : memref<8x8xf32, #tpu.memory_space<vmem>>, vector<8x8xf32>
    tpu.vector_store %arg5[%c0_9, %c0_10], %14 {strides = array<i32>} : memref<8x8xf32, #tpu.memory_space<vmem>>, vector<8x8xf32>,
    return
  }
  func.func @transform_0(%arg0: i32) -> (i32, i32) {
    %c0_i32 = arith.constant 0 : i32
    %c0_i32_0 = arith.constant 0 : i32
    return %arg0, %c0_i32 : i32, i32
  }
  func.func @transform_1(%arg0: i32) -> (i32, i32) {
    %c0_i32 = arith.constant 0 : i32
    %c0_i32_0 = arith.constant 0 : i32
    %c0_i32_1 = arith.constant 0 : i32
    return %c0_i32, %c0_i32_0 : i32, i32
  }
  func.func @transform_2(%arg0: i32) -> (i32, i32) {
    %c0_i32 = arith.constant 0 : i32
    %c0_i32_0 = arith.constant 0 : i32
    return %arg0, %c0_i32 : i32, i32
  }
  func.func @transform_3(%arg0: i32) -> (i32, i32) {
    %c0_i32 = arith.constant 0 : i32
    %c0_i32_0 = arith.constant 0 : i32
    return %arg0, %c0_i32 : i32, i32
  }
  func.func @transform_4(%arg0: i32) -> (i32, i32) {
    %c0_i32 = arith.constant 0 : i32
    %c0_i32_0 = arith.constant 0 : i32
    return %arg0, %c0_i32 : i32, i32
  }
}

</mosaic_0001>

<bundles_post_ra>
// kernel: bottleneck_forward.4
= control target key start
LH: loop header
LB: loop body
LE: loop exit
PB: predicated region body
PF: predicated region fallthrough
CT: control target
= control target key end

     0   :  { %s1022_s15 = smov 0   ;;  %s1400_s0 = inlined_call_operand.vmem [shape: bf16[512,36], index: 0, kind: input, shape index: {}]   ;;  %s1401_s1 = inlined_call_operand.vmem [shape: bf16[36,8], index: 1, kind: input, shape index: {}]   ;;  %s1402_s2 = inlined_call_operand.vmem [shape: bf16[512,8], index: 2, kind: output, shape index: {0}]   ;;  %s1403_s3 = inlined_call_operand.vmem [shape: f32[16,8], index: 3, kind: output, shape index: {1}]   ;;  %s1404_s4 = inlined_call_operand.vmem [shape: f32[16,8], index: 4, kind: output, shape index: {2}]  }
   0x1 LB: > { %s1028_s16 = sadd.s32 4294967295, %s995_s15   ;;  %p857_p0 = scmp.ge.s32.totalorder %s995_s15, 1  ;;  %s995_s15 = sphi %s1022_s15, %s15_s15  }
   0x2   : > { %p168_p1 = scmp.lt.s32.totalorder %s995_s15, 3 }
   0x4   : > { %p169_p2 = pnand %p857_p0, %p168_p1 }
   0x5   : > { %s858_s19 = sshll.u32 (!%p169_p2), %s1028_s16, 5  ;;  %p214_p4 = scmp.lt.s32.totalorder (!%p169_p2), %s1028_s16, 1 }
   0x6   : > { %172 = sbr.rel (%p169_p2) target bundleno = 276 (0x114), region = 28  ;;  %p203_p3 = scmp.lt.s32.totalorder (!%p169_p2), %s858_s19, 63 }
   0xb   : > { %v259_v0 = vld [vmem:[%s1401_s1 + $0x10] sm:$0x3]  ;;  %vm404_vm0 = vcmask 1041408   ;;  %s1406_s19 = smov (!%p203_p3, %s858_s19), 63  ;;  %v971_v4 = vld [vmem:[%s1401_s1 + $0x8] sm:$0xff]  ;;  %v970_v5 = vld [vmem:[%s1401_s1] sm:$0xff] }
   0xc   : > { %v349_v1 = vunpack.c.l.b16 %v259_v0  ;;  %s859_s22 = sshll.u32 %s1406_s19, 2  ;;  %vm355_vm1 = vcmask 293888   ;;  %vm529_vm2 = vcmask 60416   ;;  %vm562_vm3 = vcmask 64512   ;;  %s1408_s16 = smov (!%p214_p4, %s1028_s16), 1 }
   0xd   : > { %s1050_s27 = scalar_lea.vmem %s1400_s0, %s859_s22  ;;  %s1089_s30 = scalar_lea.vmem %s1402_s2, %s859_s22 }
   0xe   : > { %v352_v2 = vpack.c.b16 %v349_v1, %v349_v1  ;;  %v954_v6 = vld [vmem:[%s1050_s27] sm:$0xff]  ;;  %v955_v10 = vld [vmem:[%s1050_s27 + $0x8] sm:$0xff]  ;;  %v956_v14 = vld [vmem:[%s1050_s27 + $0x10] sm:$0xff]  ;;  %s862_s5 = sshll.u32 %s1408_s16, 3 }
   0xf   : > { %v958_v7 = vld [vmem:[%s1050_s27 + $0x20] sm:$0xff]  ;;  %v959_v11 = vld [vmem:[%s1050_s27 + $0x28] sm:$0xff]  ;;  %v960_v15 = vld [vmem:[%s1050_s27 + $0x30] sm:$0xff]  ;;  %s217_s8 = scalar_lea.vmem %s1403_s3, %s862_s5  ;;  %s221_s11 = scalar_lea.vmem %s1404_s4, %s862_s5 }
  0x10   : > { %v406_v3 = vsel %vm404_vm0, %v352_v2, 0  ;;  %v962_v8 = vld [vmem:[%s1050_s27 + $0x40] sm:$0xff]  ;;  %v963_v12 = vld [vmem:[%s1050_s27 + $0x48] sm:$0xff]  ;;  %v964_v16 = vld [vmem:[%s1050_s27 + $0x50] sm:$0xff] }
  0x11   : > { %413 = vmatpush.bf16.msra.mxu0 %v406_v3  ;;  %972 = vmatpush.bf16.msra.mxu1 %v406_v3  ;;  %v966_v9 = vld [vmem:[%s1050_s27 + $0x60] sm:$0xff]  ;;  %v967_v13 = vld [vmem:[%s1050_s27 + $0x68] sm:$0xff]  ;;  %v968_v17 = vld [vmem:[%s1050_s27 + $0x70] sm:$0xff] }
  0x12   : > { %973 = vmatpush.bf16.msra.mxu2 %v406_v3  ;;  %974 = vmatpush.bf16.msra.mxu3 %v406_v3  ;;  %v957_v18 = vld [vmem:[%s1050_s27 + $0x18] sm:$0xff] }
  0x13   : > { %v961_v19 = vld [vmem:[%s1050_s27 + $0x38] sm:$0xff] }
  0x14   : > { %v965_v20 = vld [vmem:[%s1050_s27 + $0x58] sm:$0xff] }
  0x15   : > { %414 = vmatpush.bf16.msra.mxu0 %v971_v4  ;;  %975 = vmatpush.bf16.msra.mxu1 %v971_v4  ;;  %v969_v21 = vld [vmem:[%s1050_s27 + $0x78] sm:$0xff] }
  0x16   : > { %976 = vmatpush.bf16.msra.mxu2 %v971_v4  ;;  %977 = vmatpush.bf16.msra.mxu3 %v971_v4 }
  0x19   : > { %415 = vmatpush.bf16.msra.mxu0 %v970_v5  ;;  %978 = vmatpush.bf16.msra.mxu1 %v970_v5 }
  0x1a   : > { %979 = vmatpush.bf16.msra.mxu2 %v970_v5  ;;  %980 = vmatpush.bf16.msra.mxu3 %v970_v5 }
  0x1c   : > { %936 = vmatmul.msk.bf16.vlgmr.msra.gmra.mxu0 %vm355_vm1, %v954_v6  ;;  %940 = vmatmul.msk.bf16.vlgmr.msra.gmra.mxu1 %vm355_vm1, %v958_v7 }
  0x1d   : > { %944 = vmatmul.msk.bf16.vlgmr.msra.gmra.mxu2 %vm355_vm1, %v962_v8  ;;  %948 = vmatmul.msk.bf16.vlgmr.msra.gmra.mxu3 %vm355_vm1, %v966_v9 }
  0x2c   : > { %937 = vmatmul.msk.bf16.gmra.mxu0 %vm355_vm1, %v955_v10  ;;  %941 = vmatmul.msk.bf16.gmra.mxu1 %vm355_vm1, %v959_v11 }
  0x2d   : > { %945 = vmatmul.msk.bf16.gmra.mxu2 %vm355_vm1, %v963_v12  ;;  %949 = vmatmul.msk.bf16.gmra.mxu3 %vm355_vm1, %v967_v13 }
  0x3c   : > { %938 = vmatmul.msk.bf16.gmra.mxu0 %vm355_vm1, %v956_v14  ;;  %942 = vmatmul.msk.bf16.gmra.mxu1 %vm355_vm1, %v960_v15 }
  0x3d   : > { %946 = vmatmul.msk.bf16.gmra.mxu2 %vm355_vm1, %v964_v16  ;;  %950 = vmatmul.msk.bf16.gmra.mxu3 %vm355_vm1, %v968_v17 }
  0x4c   : > { %939 = vmatmul.msk.bf16.gmra.mxu0 %vm355_vm1, %v957_v18  ;;  %943 = vmatmul.msk.bf16.gmra.mxu1 %vm355_vm1, %v961_v19 }
  0x4d   : > { %947 = vmatmul.msk.bf16.gmra.mxu2 %vm355_vm1, %v965_v20  ;;  %951 = vmatmul.msk.bf16.gmra.mxu3 %vm355_vm1, %v969_v21 }
  0x99   : > { %v1091_v22 = vpop.f32.mrf.mxu0  ;;  %v1093_v23 = vpop.f32.mrf.mxu1 }
  0x9a   : > { %v497_v24 = vpack.c.bf16 %v1091_v22, %v1091_v22  ;;  %v505_v25 = vpack.c.bf16 %v1093_v23, %v1093_v23  ;;  %v632_v2 = vmul.f32 %v1091_v22, %v1091_v22  ;;  %v563_v6 = vsel %vm562_vm3, %v1091_v22, 0.0 }
  0x9c   : > { %530 = vst.msk [vmem:[%s1089_s30] sm:$0xf] %vm529_vm2, %v497_v24  ;;  %v664_v10 = vsel %vm562_vm3, %v632_v2, 0.0 }
  0x9d   : > { %538 = vst.msk [vmem:[%s1089_s30 + $0x20] sm:$0xf] %vm529_vm2, %v505_v25 }
  0xa0   : > { %v1103_v26 = vpop.f32.mrf.mxu2  ;;  %v1111_v32 = vpop.f32.mrf.mxu3 }
  0xa1   : > { %v419_v27 = vpop.f32.mrf.mxu0  ;;  %v1105_v28 = vpop.f32.mrf.mxu1  ;;  %v513_v29 = vpack.c.bf16 %v1103_v26, %v1103_v26  ;;  %v521_v33 = vpack.c.bf16 %v1111_v32, %v1111_v32 }
  0xa2   : > { %v498_v30 = vpack.c.bf16 %v419_v27, %v419_v27  ;;  %v506_v31 = vpack.c.bf16 %v1105_v28, %v1105_v28  ;;  %v633_v62 = vmul.f32 %v419_v27, %v419_v27  ;;  %v564_v3 = vsel %vm562_vm3, %v419_v27, 0.0 }
  0xa3   : > { %546 = vst.msk [vmem:[%s1089_s30 + $0x40] sm:$0xf] %vm529_vm2, %v513_v29  ;;  %v565_v9 = vadd.f32 %v564_v3, %v563_v6  ;;  %v578_v6 = vsel %vm562_vm3, %v1093_v23, 0.0 }
  0xa4   : > { %531 = vst.msk [vmem:[%s1089_s30 + $0x4] sm:$0xf] %vm529_vm2, %v498_v30  ;;  %v665_v7 = vsel %vm562_vm3, %v633_v62, 0.0 }
  0xa5   : > { %539 = vst.msk [vmem:[%s1089_s30 + $0x24] sm:$0xf] %vm529_vm2, %v506_v31  ;;  %v666_v15 = vadd.f32 %v665_v7, %v664_v10  ;;  %v641_v7 = vmul.f32 %v1105_v28, %v1105_v28 }
  0xa6   : > { %554 = vst.msk [vmem:[%s1089_s30 + $0x60] sm:$0xf] %vm529_vm2, %v521_v33 }
  0xa8   : > { %v1123_v34 = vpop.f32.mrf.mxu2  ;;  %v1131_v40 = vpop.f32.mrf.mxu3 }
  0xa9   : > { %v422_v35 = vpop.f32.mrf.mxu0  ;;  %v1125_v36 = vpop.f32.mrf.mxu1  ;;  %v514_v37 = vpack.c.bf16 %v1123_v34, %v1123_v34  ;;  %v522_v41 = vpack.c.bf16 %v1131_v40, %v1131_v40 }
  0xaa   : > { %v499_v38 = vpack.c.bf16 %v422_v35, %v422_v35  ;;  %v507_v39 = vpack.c.bf16 %v1125_v36, %v1125_v36  ;;  %v634_v4 = vmul.f32 %v422_v35, %v422_v35  ;;  %v566_v8 = vsel %vm562_vm3, %v422_v35, 0.0 }
  0xab   : > { %547 = vst.msk [vmem:[%s1089_s30 + $0x44] sm:$0xf] %vm529_vm2, %v514_v37  ;;  %v567_v16 = vadd.f32 %v566_v8, %v565_v9 }
  0xac   : > { %532 = vst.msk [vmem:[%s1089_s30 + $0x8] sm:$0xf] %vm529_vm2, %v499_v38  ;;  %v667_v11 = vsel %vm562_vm3, %v634_v4, 0.0 }
  0xad   : > { %540 = vst.msk [vmem:[%s1089_s30 + $0x28] sm:$0xf] %vm529_vm2, %v507_v39  ;;  %v668_v29 = vadd.f32 %v667_v11, %v666_v15 }
  0xae   : > { %555 = vst.msk [vmem:[%s1089_s30 + $0x64] sm:$0xf] %vm529_vm2, %v522_v41 }
  0xb0   : > { %v1143_v42 = vpop.f32.mrf.mxu2  ;;  %v1151_v48 = vpop.f32.mrf.mxu3 }
  0xb1   : > { %v424_v43 = vpop.f32.mrf.mxu0  ;;  %v1145_v44 = vpop.f32.mrf.mxu1  ;;  %v515_v45 = vpack.c.bf16 %v1143_v42, %v1143_v42  ;;  %v523_v56 = vpack.c.bf16 %v1151_v48, %v1151_v48 }
  0xb2   : > { %v500_v46 = vpack.c.bf16 %v424_v43, %v424_v43  ;;  %v508_v47 = vpack.c.bf16 %v1145_v44, %v1145_v44  ;;  %v635_v5 = vmul.f32 %v424_v43, %v424_v43  ;;  %v568_v12 = vsel %vm562_vm3, %v424_v43, 0.0 }
  0xb3   : > { %548 = vst.msk [vmem:[%s1089_s30 + $0x48] sm:$0xf] %vm529_vm2, %v515_v45  ;;  %v569_v30 = vadd.f32 %v568_v12, %v567_v16  ;;  %v580_v12 = vsel %vm562_vm3, %v1105_v28, 0.0  ;;  %v681_v16 = vsel %vm562_vm3, %v641_v7, 0.0 }
  0xb4   : > { %533 = vst.msk [vmem:[%s1089_s30 + $0xc] sm:$0xf] %vm529_vm2, %v500_v46  ;;  %v669_v17 = vsel %vm562_vm3, %v635_v5, 0.0 }
  0xb5   : > { %541 = vst.msk [vmem:[%s1089_s30 + $0x2c] sm:$0xf] %vm529_vm2, %v508_v47  ;;  %v670_v38 = vadd.f32 %v669_v17, %v668_v29  ;;  %v582_v17 = vsel %vm562_vm3, %v1125_v36, 0.0 }
  0xb6   : > { %556 = vst.msk [vmem:[%s1089_s30 + $0x68] sm:$0xf] %vm529_vm2, %v523_v56 }
  0xb8   : > { %v1159_v49 = vpop.f32.mrf.mxu2  ;;  %v1167_v55 = vpop.f32.mrf.mxu3 }
  0xb9   : > { %v427_v50 = vpop.f32.mrf.mxu0  ;;  %v1161_v51 = vpop.f32.mrf.mxu1  ;;  %v516_v52 = vpack.c.bf16 %v1159_v49, %v1159_v49  ;;  %v524_v57 = vpack.c.bf16 %v1167_v55, %v1167_v55 }
  0xba   : > { %v501_v53 = vpack.c.bf16 %v427_v50, %v427_v50  ;;  %v509_v54 = vpack.c.bf16 %v1161_v51, %v1161_v51  ;;  %v636_v13 = vmul.f32 %v427_v50, %v427_v50  ;;  %v570_v21 = vsel %vm562_vm3, %v427_v50, 0.0 }
  0xbb   : > { %549 = vst.msk [vmem:[%s1089_s30 + $0x4c] sm:$0xf] %vm529_vm2, %v516_v52  ;;  %v571_v39 = vadd.f32 %v570_v21, %v569_v30 }
  0xbc   : > { %534 = vst.msk [vmem:[%s1089_s30 + $0x10] sm:$0xf] %vm529_vm2, %v501_v53  ;;  %v671_v31 = vsel %vm562_vm3, %v636_v13, 0.0  ;;  %v640_v53 = vmul.f32 %v1093_v23, %v1093_v23  ;;  %v642_v13 = vmul.f32 %v1125_v36, %v1125_v36  ;;  %v644_v36 = vmul.f32 %v1161_v51, %v1161_v51 }
  0xbd   : > { %542 = vst.msk [vmem:[%s1089_s30 + $0x30] sm:$0xf] %vm529_vm2, %v509_v54  ;;  %v672_v46 = vadd.f32 %v671_v31, %v670_v38 }
  0xbe   : > { %557 = vst.msk [vmem:[%s1089_s30 + $0x6c] sm:$0xf] %vm529_vm2, %v524_v57  ;;  %v679_v11 = vsel %vm562_vm3, %v640_v53, 0.0 }
  0xc0   : > { %v1183_v58 = vpop.f32.mrf.mxu2  ;;  %v1191_v1 = vpop.f32.mrf.mxu3 }
  0xc1   : > { %v429_v59 = vpop.f32.mrf.mxu0  ;;  %v1185_v60 = vpop.f32.mrf.mxu1  ;;  %v517_v61 = vpack.c.bf16 %v1183_v58, %v1183_v58  ;;  %v525_v37 = vpack.c.bf16 %v1191_v1, %v1191_v1 }
  0xc2   : > { %v502_v63 = vpack.c.bf16 %v429_v59, %v429_v59  ;;  %v510_v0 = vpack.c.bf16 %v1185_v60, %v1185_v60  ;;  %v637_v22 = vmul.f32 %v429_v59, %v429_v59  ;;  %v572_v33 = vsel %vm562_vm3, %v429_v59, 0.0 }
  0xc3   : > { %550 = vst.msk [vmem:[%s1089_s30 + $0x50] sm:$0xf] %vm529_vm2, %v517_v61  ;;  %v573_v47 = vadd.f32 %v572_v33, %v571_v39  ;;  %v645_v38 = vmul.f32 %v1185_v60, %v1185_v60 }
  0xc4   : > { %535 = vst.msk [vmem:[%s1089_s30 + $0x14] sm:$0xf] %vm529_vm2, %v502_v63  ;;  %v673_v43 = vsel %vm562_vm3, %v637_v22, 0.0 }
  0xc5   : > { %543 = vst.msk [vmem:[%s1089_s30 + $0x34] sm:$0xf] %vm529_vm2, %v510_v0  ;;  %v674_v54 = vadd.f32 %v673_v43, %v672_v46  ;;  %v687_v43 = vsel %vm562_vm3, %v644_v36, 0.0 }
  0xc6   : > { %558 = vst.msk [vmem:[%s1089_s30 + $0x70] sm:$0xf] %vm529_vm2, %v525_v37 }
  0xc8   : > { %v1209_v14 = vpop.f32.mrf.mxu2  ;;  %v1219_v27 = vpop.f32.mrf.mxu3 }
  0xc9   : > { %v432_v18 = vpop.f32.mrf.mxu0  ;;  %v1212_v19 = vpop.f32.mrf.mxu1  ;;  %v518_v20 = vpack.c.bf16 %v1209_v14, %v1209_v14  ;;  %v526_v41 = vpack.c.bf16 %v1219_v27, %v1219_v27 }
  0xca   : > { %v503_v24 = vpack.c.bf16 %v432_v18, %v432_v18  ;;  %v511_v25 = vpack.c.bf16 %v1212_v19, %v1212_v19  ;;  %v638_v35 = vmul.f32 %v432_v18, %v432_v18  ;;  %v574_v45 = vsel %vm562_vm3, %v432_v18, 0.0 }
  0xcb   : > { %551 = vst.msk [vmem:[%s1089_s30 + $0x54] sm:$0xf] %vm529_vm2, %v518_v20  ;;  %v575_v56 = vadd.f32 %v574_v45, %v573_v47  ;;  %v643_v18 = vmul.f32 %v1145_v44, %v1145_v44  ;;  %v588_v45 = vsel %vm562_vm3, %v1185_v60, 0.0  ;;  %v646_v46 = vmul.f32 %v1212_v19, %v1212_v19 }
  0xcc   : > { %536 = vst.msk [vmem:[%s1089_s30 + $0x18] sm:$0xf] %vm529_vm2, %v503_v24  ;;  %v675_v50 = vsel %vm562_vm3, %v638_v35, 0.0  ;;  %v683_v24 = vsel %vm562_vm3, %v642_v13, 0.0  ;;  %v590_v53 = vsel %vm562_vm3, %v1212_v19, 0.0 }
  0xcd   : > { %544 = vst.msk [vmem:[%s1089_s30 + $0x38] sm:$0xf] %vm529_vm2, %v511_v25  ;;  %v676_v4 = vadd.f32 %v675_v50, %v674_v54  ;;  %v584_v25 = vsel %vm562_vm3, %v1145_v44, 0.0  ;;  %v685_v37 = vsel %vm562_vm3, %v643_v18, 0.0  ;;  %v586_v44 = vsel %vm562_vm3, %v1161_v51, 0.0 }
  0xce   : > { %559 = vst.msk [vmem:[%s1089_s30 + $0x74] sm:$0xf] %vm529_vm2, %v526_v41  ;;  %v689_v51 = vsel %vm562_vm3, %v645_v38, 0.0  ;;  %v656_v38 = vmul.f32 %v1111_v32, %v1111_v32 }
  0xd0   : > { %v1240_v52 = vpop.f32.mrf.mxu2  ;;  %v1247_v3 = vpop.f32.mrf.mxu3 }
  0xd1   : > { %v434_v57 = vpop.f32.mrf.mxu0  ;;  %v454_v59 = vpop.f32.mrf.mxu1  ;;  %v519_v61 = vpack.c.bf16 %v1240_v52, %v1240_v52  ;;  %v527_v29 = vpack.c.bf16 %v1247_v3, %v1247_v3  ;;  %v654_v36 = vmul.f32 %v1240_v52, %v1240_v52 }
  0xd2   : > { %v504_v62 = vpack.c.bf16 %v434_v57, %v434_v57  ;;  %v576_v63 = vsel %vm562_vm3, %v434_v57, 0.0  ;;  %v639_v0 = vmul.f32 %v434_v57, %v434_v57  ;;  %v512_v2 = vpack.c.bf16 %v454_v59, %v454_v59 }
  0xd3   : > { %v577_v5 = vadd.f32 %v576_v63, %v575_v56  ;;  %552 = vst.msk [vmem:[%s1089_s30 + $0x58] sm:$0xf] %vm529_vm2, %v519_v61  ;;  %v647_v54 = vmul.f32 %v454_v59, %v454_v59  ;;  %v648_v61 = vmul.f32 %v1103_v26, %v1103_v26  ;;  %v592_v60 = vsel %vm562_vm3, %v454_v59, 0.0 }
  0xd4   : > { %537 = vst.msk [vmem:[%s1089_s30 + $0x1c] sm:$0xf] %vm529_vm2, %v504_v62  ;;  %v677_v8 = vsel %vm562_vm3, %v639_v0, 0.0  ;;  %v691_v62 = vsel %vm562_vm3, %v646_v46, 0.0  ;;  %v650_v59 = vmul.f32 %v1143_v42, %v1143_v42 }
  0xd5   : > { %v579_v9 = vadd.f32 %v578_v6, %v577_v5  ;;  %v678_v10 = vadd.f32 %v677_v8, %v676_v4  ;;  %545 = vst.msk [vmem:[%s1089_s30 + $0x3c] sm:$0xf] %vm529_vm2, %v512_v2  ;;  %v594_v2 = vsel %vm562_vm3, %v1103_v26, 0.0  ;;  %v649_v4 = vmul.f32 %v1123_v34, %v1123_v34 }
  0xd6   : > { %560 = vst.msk [vmem:[%s1089_s30 + $0x78] sm:$0xf] %vm529_vm2, %v527_v29  ;;  %v693_v19 = vsel %vm562_vm3, %v647_v54, 0.0  ;;  %v695_v7 = vsel %vm562_vm3, %v648_v61, 0.0  ;;  %v596_v8 = vsel %vm562_vm3, %v1123_v34, 0.0  ;;  %v598_v26 = vsel %vm562_vm3, %v1143_v42, 0.0 }
  0xd7   : > { %v581_v23 = vadd.f32 %v580_v12, %v579_v9  ;;  %v680_v15 = vadd.f32 %v679_v11, %v678_v10  ;;  %v697_v11 = vsel %vm562_vm3, %v649_v4, 0.0  ;;  %v651_v12 = vmul.f32 %v1159_v49, %v1159_v49 }
  0xd8   : > { %v1270_v20 = vpop.f32.mrf.mxu2  ;;  %v1281_v30 = vpop.f32.mrf.mxu3  ;;  %v600_v34 = vsel %vm562_vm3, %v1159_v49, 0.0  ;;  %v602_v42 = vsel %vm562_vm3, %v1183_v58, 0.0  ;;  %v604_v49 = vsel %vm562_vm3, %v1209_v14, 0.0  ;;  %v659_v61 = vmul.f32 %v1167_v55, %v1167_v55 }
  0xd9   : > { %v583_v21 = vadd.f32 %v582_v17, %v581_v23  ;;  %v682_v22 = vadd.f32 %v681_v16, %v680_v15  ;;  %v520_v28 = vpack.c.bf16 %v1270_v20, %v1270_v20  ;;  %v528_v35 = vpack.c.bf16 %v1281_v30, %v1281_v30 }
  0xda   : > { %v699_v15 = vsel %vm562_vm3, %v650_v59, 0.0  ;;  %v652_v16 = vmul.f32 %v1183_v58, %v1183_v58  ;;  %v606_v58 = vsel %vm562_vm3, %v1240_v52, 0.0  ;;  %v657_v52 = vmul.f32 %v1131_v40, %v1131_v40 }
  0xdb   : > { %v684_v31 = vadd.f32 %v683_v24, %v682_v22  ;;  %v585_v33 = vadd.f32 %v584_v25, %v583_v21  ;;  %553 = vst.msk [vmem:[%s1089_s30 + $0x5c] sm:$0xf] %vm529_vm2, %v520_v28  ;;  %v701_v21 = vsel %vm562_vm3, %v651_v12, 0.0  ;;  %v653_v22 = vmul.f32 %v1209_v14, %v1209_v14 }
  0xdc   : > { %561 = vst.msk [vmem:[%s1089_s30 + $0x7c] sm:$0xf] %vm529_vm2, %v528_v35  ;;  %v703_v25 = vsel %vm562_vm3, %v652_v16, 0.0  ;;  %v655_v35 = vmul.f32 %v1270_v20, %v1270_v20  ;;  %v707_v14 = vsel %vm562_vm3, %v654_v36, 0.0  ;;  %v662_v59 = vmul.f32 %v1247_v3, %v1247_v3 }
  0xdd   : > { %v587_v39 = vadd.f32 %v586_v44, %v585_v33  ;;  %v686_v41 = vadd.f32 %v685_v37, %v684_v31  ;;  %v705_v33 = vsel %vm562_vm3, %v653_v22, 0.0 }
  0xde   : > { %v709_v46 = vsel %vm562_vm3, %v655_v35, 0.0 }
  0xdf   : > { %v589_v47 = vadd.f32 %v588_v45, %v587_v39  ;;  %v688_v50 = vadd.f32 %v687_v43, %v686_v41  ;;  %v608_v39 = vsel %vm562_vm3, %v1270_v20, 0.0  ;;  %v610_v45 = vsel %vm562_vm3, %v1111_v32, 0.0 }
  0xe0   : > { %v658_v20 = vmul.f32 %v1151_v48, %v1151_v48  ;;  %v614_v32 = vsel %vm562_vm3, %v1151_v48, 0.0  ;;  %v618_v48 = vsel %vm562_vm3, %v1191_v1, 0.0 }
  0xe1   : > { %v591_v56 = vadd.f32 %v590_v53, %v589_v47  ;;  %v690_v57 = vadd.f32 %v689_v51, %v688_v50  ;;  %v711_v51 = vsel %vm562_vm3, %v656_v38, 0.0  ;;  %v612_v53 = vsel %vm562_vm3, %v1131_v40, 0.0 }
  0xe2   : > { %v616_v40 = vsel %vm562_vm3, %v1167_v55, 0.0  ;;  %v620_v55 = vsel %vm562_vm3, %v1219_v27, 0.0 }
  0xe3   : > { %v692_v63 = vadd.f32 %v691_v62, %v690_v57  ;;  %v593_v0 = vadd.f32 %v592_v60, %v591_v56  ;;  %v713_v57 = vsel %vm562_vm3, %v657_v52, 0.0 }
  0xe5   : > { %v595_v5 = vadd.f32 %v594_v2, %v593_v0  ;;  %v694_v6 = vadd.f32 %v693_v19, %v692_v63  ;;  %v715_v63 = vsel %vm562_vm3, %v658_v20, 0.0  ;;  %v660_v0 = vmul.f32 %v1191_v1, %v1191_v1 }
  0xe6   : > { %v717_v19 = vsel %vm562_vm3, %v659_v61, 0.0  ;;  %v622_v1 = vsel %vm562_vm3, %v1247_v3, 0.0 }
  0xe7   : > { %v597_v9 = vadd.f32 %v596_v8, %v595_v5  ;;  %v696_v10 = vadd.f32 %v695_v7, %v694_v6  ;;  %v661_v5 = vmul.f32 %v1219_v27, %v1219_v27  ;;  %v719_v8 = vsel %vm562_vm3, %v660_v0, 0.0 }
  0xe8   : > { %v624_v27 = vsel %vm562_vm3, %v1281_v30, 0.0 }
  0xe9   : > { %v599_v13 = vadd.f32 %v598_v26, %v597_v9  ;;  %v698_v23 = vadd.f32 %v697_v11, %v696_v10  ;;  %v721_v11 = vsel %vm562_vm3, %v661_v5, 0.0  ;;  %v663_v26 = vmul.f32 %v1281_v30, %v1281_v30 }
  0xeb   : > { %v700_v17 = vadd.f32 %v699_v15, %v698_v23  ;;  %v601_v18 = vadd.f32 %v600_v34, %v599_v13  ;;  %v723_v23 = vsel %vm562_vm3, %v662_v59, 0.0  ;;  %v725_v16 = vsel %vm562_vm3, %v663_v26, 0.0 }
  0xed   : > { %v603_v28 = vadd.f32 %v602_v42, %v601_v18  ;;  %v702_v24 = vadd.f32 %v701_v21, %v700_v17 }
  0xef   : > { %v605_v29 = vadd.f32 %v604_v49, %v603_v28  ;;  %v704_v31 = vadd.f32 %v703_v25, %v702_v24 }
  0xf1   : > { %v706_v37 = vadd.f32 %v705_v33, %v704_v31  ;;  %v607_v44 = vadd.f32 %v606_v58, %v605_v29 }
  0xf3   : > { %v708_v41 = vadd.f32 %v707_v14, %v706_v37  ;;  %v609_v43 = vadd.f32 %v608_v39, %v607_v44 }
  0xf5   : > { %v611_v47 = vadd.f32 %v610_v45, %v609_v43  ;;  %v710_v50 = vadd.f32 %v709_v46, %v708_v41 }
  0xf7   : > { %v613_v54 = vadd.f32 %v612_v53, %v611_v47  ;;  %v712_v56 = vadd.f32 %v711_v51, %v710_v50 }
  0xf9   : > { %v615_v62 = vadd.f32 %v614_v32, %v613_v54  ;;  %v714_v60 = vadd.f32 %v713_v57, %v712_v56 }
  0xfb   : > { %v716_v2 = vadd.f32 %v715_v63, %v714_v60  ;;  %v617_v4 = vadd.f32 %v616_v40, %v615_v62 }
  0xfd   : > { %v619_v6 = vadd.f32 %v618_v48, %v617_v4  ;;  %v718_v7 = vadd.f32 %v717_v19, %v716_v2 }
  0xff   : > { %v621_v9 = vadd.f32 %v620_v55, %v619_v6  ;;  %v720_v10 = vadd.f32 %v719_v8, %v718_v7 }
 0x101   : > { %v722_v12 = vadd.f32 %v721_v11, %v720_v10  ;;  %v623_v13 = vadd.f32 %v622_v1, %v621_v9 }
 0x103   : > { %v724_v15 = vadd.f32 %v723_v23, %v722_v12  ;;  %v625_v34 = vadd.f32 %v624_v27, %v623_v13 }
 0x105   : > { %v626_v17 = vrot.slane %v625_v34, 4  ;;  %v726_v18 = vadd.f32 %v725_v16, %v724_v15 }
 0x107   : > { %v627_v21 = vadd.f32 %v626_v17, %v625_v34  ;;  %v727_v3 = vrot.slane %v726_v18, 4 }
 0x109   : > { %v628_v42 = vrot.slane %v627_v21, 2  ;;  %v728_v22 = vadd.f32 %v727_v3, %v726_v18 }
 0x10b   : > { %v629_v28 = vadd.f32 %v628_v42, %v627_v21  ;;  %v729_v24 = vrot.slane %v728_v22, 2 }
 0x10d   : > { %v630_v25 = vrot.slane %v629_v28, 1  ;;  %v730_v49 = vadd.f32 %v729_v24, %v728_v22 }
 0x10f   : > { %v631_v30 = vadd.f32 %v630_v25, %v629_v28  ;;  %v731_v36 = vrot.slane %v730_v49, 1 }
 0x111   : > { %v732_v29 = vadd.f32 %v731_v36, %v730_v49  ;;  %733 = vst.msk [vmem:[%s217_s8] sm:$0xff] %vm562_vm3, %v631_v30 }
 0x113   : > { %734 = vst.msk [vmem:[%s221_s11] sm:$0xff] %vm562_vm3, %v732_v29 }
 0x114 PF: > { %s15_s15 = sadd.s32 1, %s995_s15  }
 0x115   : > { %p12_p5 = scmp.ge.s32.totalorder %s15_s15, 4  }
 0x117   :  { %14 = sbr.rel (!%p12_p5) target bundleno = 1 (0x1), region = 82 }

// kernel: bottleneck_forward.5
= control target key start
LH: loop header
LB: loop body
LE: loop exit
PB: predicated region body
PF: predicated region fallthrough
CT: control target
= control target key end

     0   :  { %s591_s12 = smov 0   ;;  %s773_s0 = inlined_call_operand.vmem [shape: bf16[512,8], index: 0, kind: input, shape index: {}]   ;;  %s774_s1 = inlined_call_operand.vmem [shape: f32[1,8], index: 1, kind: input, shape index: {}]   ;;  %s775_s2 = inlined_call_operand.vmem [shape: f32[1,8], index: 2, kind: input, shape index: {}]   ;;  %s776_s3 = inlined_call_operand.vmem [shape: bf16[512,8], index: 3, kind: output, shape index: {}]  }
   0x1 LB: > { %s463_s13 = sadd.s32 4294967295, %s569_s12   ;;  %p467_p0 = scmp.ge.s32.totalorder %s569_s12, 1  ;;  %s569_s12 = sphi %s591_s12, %s13_s12  }
   0x2   : > { %p138_p1 = scmp.lt.s32.totalorder %s569_s12, 3 }
   0x4   : > { %p139_p2 = pnand %p467_p0, %p138_p1 }
   0x5   : > { %s468_s14 = sshll.u32 (!%p139_p2), %s463_s13, 5 }
   0x6   : > { %142 = sbr.rel (%p139_p2) target bundleno = 63 (0x3f), region = 32  ;;  %p163_p3 = scmp.lt.s32.totalorder (!%p139_p2), %s468_s14, 63 }
   0xb   : > { %s778_s14 = smov (!%p163_p3, %s468_s14), 63  ;;  %v612_v0 = vld [vmem:[%s774_s1] ss:$0 sm:$0xff]  ;;  %vm374_vm0 = vcmask 60416  }
   0xc   : > { %s469_s15 = sshll.u32 %s778_s14, 2  ;;  %v620_v5 = vld [vmem:[%s775_s2] ss:$0 sm:$0xff] }
   0xd   : > { %s607_s18 = scalar_lea.vmem %s773_s0, %s469_s15  ;;  %s644_s25 = scalar_lea.vmem %s776_s3, %s469_s15 }
   0xe   : > { %v475_v1 = vld [vmem:[%s607_s18] sm:$0xff]   ;;  %v538_v2 = vld [vmem:[%s607_s18 + $0x8] sm:$0xff]   ;;  %v539_v3 = vld [vmem:[%s607_s18 + $0x10] sm:$0xff]  }
   0xf   : > { %v476_v4 = vunpack.c.l.bf16 %v475_v1  ;;  %v477_v6 = vunpack.c.h.bf16 %v475_v1  ;;  %v480_v7 = vunpack.c.l.bf16 %v538_v2  ;;  %v481_v8 = vunpack.c.h.bf16 %v538_v2  ;;  %v540_v9 = vld [vmem:[%s607_s18 + $0x18] sm:$0xff]   ;;  %v541_v38 = vld [vmem:[%s607_s18 + $0x20] sm:$0xff]   ;;  %v542_v39 = vld [vmem:[%s607_s18 + $0x28] sm:$0xff]  }
  0x10   : > { %v484_v10 = vunpack.c.l.bf16 %v539_v3  ;;  %v485_v11 = vunpack.c.h.bf16 %v539_v3  ;;  %v488_v12 = vunpack.c.l.bf16 %v540_v9  ;;  %v489_v13 = vunpack.c.h.bf16 %v540_v9  ;;  %v543_v44 = vld [vmem:[%s607_s18 + $0x30] sm:$0xff]   ;;  %v544_v45 = vld [vmem:[%s607_s18 + $0x38] sm:$0xff]  }
  0x11   : > { %v242_v14 = vmul.f32 %v612_v0, %v476_v4  ;;  %v243_v15 = vmul.f32 %v612_v0, %v477_v6  ;;  %v244_v16 = vmul.f32 %v612_v0, %v480_v7  ;;  %v245_v17 = vmul.f32 %v612_v0, %v481_v8 }
  0x12   : > { %v246_v18 = vmul.f32 %v612_v0, %v484_v10  ;;  %v247_v19 = vmul.f32 %v612_v0, %v485_v11  ;;  %v248_v20 = vmul.f32 %v612_v0, %v488_v12  ;;  %v249_v21 = vmul.f32 %v612_v0, %v489_v13  ;;  %v545_v12 = vld [vmem:[%s607_s18 + $0x40] sm:$0xff]   ;;  %v546_v13 = vld [vmem:[%s607_s18 + $0x48] sm:$0xff]  }
  0x13   : > { %v278_v22 = vadd.f32 %v620_v5, %v242_v14  ;;  %v279_v23 = vadd.f32 %v620_v5, %v243_v15  ;;  %v280_v24 = vadd.f32 %v620_v5, %v244_v16  ;;  %v281_v25 = vadd.f32 %v620_v5, %v245_v17 }
  0x14   : > { %v282_v26 = vadd.f32 %v620_v5, %v246_v18  ;;  %v283_v27 = vadd.f32 %v620_v5, %v247_v19  ;;  %v284_v28 = vadd.f32 %v620_v5, %v248_v20  ;;  %v285_v29 = vadd.f32 %v620_v5, %v249_v21 }
  0x15   : > { %v310_v30 = vmax.f32 %v278_v22, 0.0  ;;  %v311_v31 = vmax.f32 %v279_v23, 0.0  ;;  %v312_v32 = vmax.f32 %v280_v24, 0.0  ;;  %v313_v33 = vmax.f32 %v281_v25, 0.0 }
  0x16   : > { %v314_v34 = vmax.f32 %v282_v26, 0.0  ;;  %v315_v35 = vmax.f32 %v283_v27, 0.0  ;;  %v316_v36 = vmax.f32 %v284_v28, 0.0  ;;  %v317_v37 = vmax.f32 %v285_v29, 0.0  ;;  %v547_v26 = vld [vmem:[%s607_s18 + $0x50] sm:$0xff]   ;;  %v548_v27 = vld [vmem:[%s607_s18 + $0x58] sm:$0xff]  }
  0x17   : > { %v342_v40 = vpack.c.bf16 %v310_v30, %v310_v30  ;;  %v343_v41 = vpack.c.bf16 %v311_v31, %v311_v31  ;;  %v344_v42 = vpack.c.bf16 %v312_v32, %v312_v32  ;;  %v345_v43 = vpack.c.bf16 %v313_v33, %v313_v33 }
  0x18   : > { %v346_v46 = vpack.c.bf16 %v314_v34, %v314_v34  ;;  %v347_v47 = vpack.c.bf16 %v315_v35, %v315_v35  ;;  %v348_v48 = vpack.c.bf16 %v316_v36, %v316_v36  ;;  %v349_v49 = vpack.c.bf16 %v317_v37, %v317_v37 }
  0x19   : > { %375 = vst.msk [vmem:[%s644_s25] sm:$0xf] %vm374_vm0, %v342_v40  ;;  %v492_v50 = vunpack.c.l.bf16 %v541_v38  ;;  %v493_v51 = vunpack.c.h.bf16 %v541_v38  ;;  %v496_v52 = vunpack.c.l.bf16 %v542_v39  ;;  %v497_v53 = vunpack.c.h.bf16 %v542_v39 }
  0x1a   : > { %376 = vst.msk [vmem:[%s644_s25 + $0x4] sm:$0xf] %vm374_vm0, %v343_v41  ;;  %v500_v54 = vunpack.c.l.bf16 %v543_v44  ;;  %v501_v55 = vunpack.c.h.bf16 %v543_v44  ;;  %v504_v56 = vunpack.c.l.bf16 %v544_v45  ;;  %v505_v57 = vunpack.c.h.bf16 %v544_v45 }
  0x1b   : > { %377 = vst.msk [vmem:[%s644_s25 + $0x8] sm:$0xf] %vm374_vm0, %v344_v42  ;;  %v250_v58 = vmul.f32 %v612_v0, %v492_v50  ;;  %v251_v59 = vmul.f32 %v612_v0, %v493_v51  ;;  %v252_v60 = vmul.f32 %v612_v0, %v496_v52  ;;  %v253_v61 = vmul.f32 %v612_v0, %v497_v53 }
  0x1c   : > { %378 = vst.msk [vmem:[%s644_s25 + $0xc] sm:$0xf] %vm374_vm0, %v345_v43  ;;  %v254_v62 = vmul.f32 %v612_v0, %v500_v54  ;;  %v255_v63 = vmul.f32 %v612_v0, %v501_v55  ;;  %v256_v1 = vmul.f32 %v612_v0, %v504_v56  ;;  %v257_v2 = vmul.f32 %v612_v0, %v505_v57  ;;  %v549_v56 = vld [vmem:[%s607_s18 + $0x60] sm:$0xff]   ;;  %v550_v57 = vld [vmem:[%s607_s18 + $0x68] sm:$0xff]  }
  0x1d   : > { %379 = vst.msk [vmem:[%s644_s25 + $0x10] sm:$0xf] %vm374_vm0, %v346_v46  ;;  %v286_v3 = vadd.f32 %v620_v5, %v250_v58  ;;  %v287_v4 = vadd.f32 %v620_v5, %v251_v59  ;;  %v288_v6 = vadd.f32 %v620_v5, %v252_v60  ;;  %v289_v7 = vadd.f32 %v620_v5, %v253_v61 }
  0x1e   : > { %380 = vst.msk [vmem:[%s644_s25 + $0x14] sm:$0xf] %vm374_vm0, %v347_v47  ;;  %v290_v8 = vadd.f32 %v620_v5, %v254_v62  ;;  %v291_v9 = vadd.f32 %v620_v5, %v255_v63  ;;  %v292_v10 = vadd.f32 %v620_v5, %v256_v1  ;;  %v293_v11 = vadd.f32 %v620_v5, %v257_v2 }
  0x1f   : > { %381 = vst.msk [vmem:[%s644_s25 + $0x18] sm:$0xf] %vm374_vm0, %v348_v48  ;;  %v318_v14 = vmax.f32 %v286_v3, 0.0  ;;  %v319_v15 = vmax.f32 %v287_v4, 0.0  ;;  %v320_v16 = vmax.f32 %v288_v6, 0.0  ;;  %v321_v17 = vmax.f32 %v289_v7, 0.0 }
  0x20   : > { %382 = vst.msk [vmem:[%s644_s25 + $0x1c] sm:$0xf] %vm374_vm0, %v349_v49  ;;  %v322_v18 = vmax.f32 %v290_v8, 0.0  ;;  %v323_v19 = vmax.f32 %v291_v9, 0.0  ;;  %v324_v20 = vmax.f32 %v292_v10, 0.0  ;;  %v325_v21 = vmax.f32 %v293_v11, 0.0 }
  0x21   : > { %v350_v22 = vpack.c.bf16 %v318_v14, %v318_v14  ;;  %v351_v23 = vpack.c.bf16 %v319_v15, %v319_v15  ;;  %v352_v24 = vpack.c.bf16 %v320_v16, %v320_v16  ;;  %v353_v25 = vpack.c.bf16 %v321_v17, %v321_v17  ;;  %v551_v8 = vld [vmem:[%s607_s18 + $0x70] sm:$0xff]   ;;  %v552_v9 = vld [vmem:[%s607_s18 + $0x78] sm:$0xff]  }
  0x22   : > { %v354_v28 = vpack.c.bf16 %v322_v18, %v322_v18  ;;  %v355_v29 = vpack.c.bf16 %v323_v19, %v323_v19  ;;  %v356_v30 = vpack.c.bf16 %v324_v20, %v324_v20  ;;  %v357_v31 = vpack.c.bf16 %v325_v21, %v325_v21 }
  0x23   : > { %383 = vst.msk [vmem:[%s644_s25 + $0x20] sm:$0xf] %vm374_vm0, %v350_v22  ;;  %v508_v32 = vunpack.c.l.bf16 %v545_v12  ;;  %v509_v33 = vunpack.c.h.bf16 %v545_v12  ;;  %v512_v34 = vunpack.c.l.bf16 %v546_v13  ;;  %v513_v35 = vunpack.c.h.bf16 %v546_v13 }
  0x24   : > { %384 = vst.msk [vmem:[%s644_s25 + $0x24] sm:$0xf] %vm374_vm0, %v351_v23  ;;  %v516_v36 = vunpack.c.l.bf16 %v547_v26  ;;  %v517_v37 = vunpack.c.h.bf16 %v547_v26  ;;  %v520_v38 = vunpack.c.l.bf16 %v548_v27  ;;  %v521_v39 = vunpack.c.h.bf16 %v548_v27 }
  0x25   : > { %385 = vst.msk [vmem:[%s644_s25 + $0x28] sm:$0xf] %vm374_vm0, %v352_v24  ;;  %v258_v40 = vmul.f32 %v612_v0, %v508_v32  ;;  %v259_v41 = vmul.f32 %v612_v0, %v509_v33  ;;  %v260_v42 = vmul.f32 %v612_v0, %v512_v34  ;;  %v261_v43 = vmul.f32 %v612_v0, %v513_v35 }
  0x26   : > { %386 = vst.msk [vmem:[%s644_s25 + $0x2c] sm:$0xf] %vm374_vm0, %v353_v25  ;;  %v262_v44 = vmul.f32 %v612_v0, %v516_v36  ;;  %v263_v45 = vmul.f32 %v612_v0, %v517_v37  ;;  %v264_v46 = vmul.f32 %v612_v0, %v520_v38  ;;  %v265_v47 = vmul.f32 %v612_v0, %v521_v39 }
  0x27   : > { %387 = vst.msk [vmem:[%s644_s25 + $0x30] sm:$0xf] %vm374_vm0, %v354_v28  ;;  %v294_v48 = vadd.f32 %v620_v5, %v258_v40  ;;  %v295_v49 = vadd.f32 %v620_v5, %v259_v41  ;;  %v296_v50 = vadd.f32 %v620_v5, %v260_v42  ;;  %v297_v51 = vadd.f32 %v620_v5, %v261_v43 }
  0x28   : > { %388 = vst.msk [vmem:[%s644_s25 + $0x34] sm:$0xf] %vm374_vm0, %v355_v29  ;;  %v298_v52 = vadd.f32 %v620_v5, %v262_v44  ;;  %v299_v53 = vadd.f32 %v620_v5, %v263_v45  ;;  %v300_v54 = vadd.f32 %v620_v5, %v264_v46  ;;  %v301_v55 = vadd.f32 %v620_v5, %v265_v47 }
  0x29   : > { %389 = vst.msk [vmem:[%s644_s25 + $0x38] sm:$0xf] %vm374_vm0, %v356_v30  ;;  %v326_v58 = vmax.f32 %v294_v48, 0.0  ;;  %v327_v59 = vmax.f32 %v295_v49, 0.0  ;;  %v328_v60 = vmax.f32 %v296_v50, 0.0  ;;  %v329_v61 = vmax.f32 %v297_v51, 0.0 }
  0x2a   : > { %390 = vst.msk [vmem:[%s644_s25 + $0x3c] sm:$0xf] %vm374_vm0, %v357_v31  ;;  %v330_v62 = vmax.f32 %v298_v52, 0.0  ;;  %v331_v63 = vmax.f32 %v299_v53, 0.0  ;;  %v332_v1 = vmax.f32 %v300_v54, 0.0  ;;  %v333_v2 = vmax.f32 %v301_v55, 0.0 }
  0x2b   : > { %v358_v3 = vpack.c.bf16 %v326_v58, %v326_v58  ;;  %v359_v4 = vpack.c.bf16 %v327_v59, %v327_v59  ;;  %v360_v6 = vpack.c.bf16 %v328_v60, %v328_v60  ;;  %v361_v7 = vpack.c.bf16 %v329_v61, %v329_v61 }
  0x2c   : > { %v362_v10 = vpack.c.bf16 %v330_v62, %v330_v62  ;;  %v363_v11 = vpack.c.bf16 %v331_v63, %v331_v63  ;;  %v364_v12 = vpack.c.bf16 %v332_v1, %v332_v1  ;;  %v365_v13 = vpack.c.bf16 %v333_v2, %v333_v2 }
  0x2d   : > { %391 = vst.msk [vmem:[%s644_s25 + $0x40] sm:$0xf] %vm374_vm0, %v358_v3  ;;  %v524_v14 = vunpack.c.l.bf16 %v549_v56  ;;  %v525_v15 = vunpack.c.h.bf16 %v549_v56  ;;  %v528_v16 = vunpack.c.l.bf16 %v550_v57  ;;  %v529_v17 = vunpack.c.h.bf16 %v550_v57 }
  0x2e   : > { %392 = vst.msk [vmem:[%s644_s25 + $0x44] sm:$0xf] %vm374_vm0, %v359_v4  ;;  %v532_v18 = vunpack.c.l.bf16 %v551_v8  ;;  %v533_v19 = vunpack.c.h.bf16 %v551_v8  ;;  %v536_v20 = vunpack.c.l.bf16 %v552_v9  ;;  %v537_v21 = vunpack.c.h.bf16 %v552_v9 }
  0x2f   : > { %393 = vst.msk [vmem:[%s644_s25 + $0x48] sm:$0xf] %vm374_vm0, %v360_v6  ;;  %v266_v22 = vmul.f32 %v612_v0, %v524_v14  ;;  %v267_v23 = vmul.f32 %v612_v0, %v525_v15  ;;  %v268_v24 = vmul.f32 %v612_v0, %v528_v16  ;;  %v269_v25 = vmul.f32 %v612_v0, %v529_v17 }
  0x30   : > { %394 = vst.msk [vmem:[%s644_s25 + $0x4c] sm:$0xf] %vm374_vm0, %v361_v7  ;;  %v270_v26 = vmul.f32 %v612_v0, %v532_v18  ;;  %v271_v27 = vmul.f32 %v612_v0, %v533_v19  ;;  %v272_v28 = vmul.f32 %v612_v0, %v536_v20  ;;  %v273_v29 = vmul.f32 %v612_v0, %v537_v21 }
  0x31   : > { %395 = vst.msk [vmem:[%s644_s25 + $0x50] sm:$0xf] %vm374_vm0, %v362_v10  ;;  %v302_v30 = vadd.f32 %v620_v5, %v266_v22  ;;  %v303_v31 = vadd.f32 %v620_v5, %v267_v23  ;;  %v304_v32 = vadd.f32 %v620_v5, %v268_v24  ;;  %v305_v33 = vadd.f32 %v620_v5, %v269_v25 }
  0x32   : > { %396 = vst.msk [vmem:[%s644_s25 + $0x54] sm:$0xf] %vm374_vm0, %v363_v11  ;;  %v306_v34 = vadd.f32 %v620_v5, %v270_v26  ;;  %v307_v35 = vadd.f32 %v620_v5, %v271_v27  ;;  %v308_v36 = vadd.f32 %v620_v5, %v272_v28  ;;  %v309_v0 = vadd.f32 %v620_v5, %v273_v29 }
  0x33   : > { %397 = vst.msk [vmem:[%s644_s25 + $0x58] sm:$0xf] %vm374_vm0, %v364_v12  ;;  %v334_v37 = vmax.f32 %v302_v30, 0.0  ;;  %v335_v38 = vmax.f32 %v303_v31, 0.0  ;;  %v336_v39 = vmax.f32 %v304_v32, 0.0  ;;  %v337_v40 = vmax.f32 %v305_v33, 0.0 }
  0x34   : > { %398 = vst.msk [vmem:[%s644_s25 + $0x5c] sm:$0xf] %vm374_vm0, %v365_v13  ;;  %v338_v41 = vmax.f32 %v306_v34, 0.0  ;;  %v339_v42 = vmax.f32 %v307_v35, 0.0  ;;  %v340_v45 = vmax.f32 %v308_v36, 0.0  ;;  %v341_v47 = vmax.f32 %v309_v0, 0.0 }
  0x35   : > { %v366_v43 = vpack.c.bf16 %v334_v37, %v334_v37  ;;  %v367_v44 = vpack.c.bf16 %v335_v38, %v335_v38  ;;  %v368_v5 = vpack.c.bf16 %v336_v39, %v336_v39  ;;  %v369_v46 = vpack.c.bf16 %v337_v40, %v337_v40 }
  0x36   : > { %v370_v48 = vpack.c.bf16 %v338_v41, %v338_v41  ;;  %v371_v49 = vpack.c.bf16 %v339_v42, %v339_v42  ;;  %v372_v50 = vpack.c.bf16 %v340_v45, %v340_v45  ;;  %v373_v51 = vpack.c.bf16 %v341_v47, %v341_v47 }
  0x37   : > { %399 = vst.msk [vmem:[%s644_s25 + $0x60] sm:$0xf] %vm374_vm0, %v366_v43 }
  0x38   : > { %400 = vst.msk [vmem:[%s644_s25 + $0x64] sm:$0xf] %vm374_vm0, %v367_v44 }
  0x39   : > { %401 = vst.msk [vmem:[%s644_s25 + $0x68] sm:$0xf] %vm374_vm0, %v368_v5 }
  0x3a   : > { %402 = vst.msk [vmem:[%s644_s25 + $0x6c] sm:$0xf] %vm374_vm0, %v369_v46 }
  0x3b   : > { %403 = vst.msk [vmem:[%s644_s25 + $0x70] sm:$0xf] %vm374_vm0, %v370_v48 }
  0x3c   : > { %404 = vst.msk [vmem:[%s644_s25 + $0x74] sm:$0xf] %vm374_vm0, %v371_v49 }
  0x3d   : > { %405 = vst.msk [vmem:[%s644_s25 + $0x78] sm:$0xf] %vm374_vm0, %v372_v50 }
  0x3e   : > { %406 = vst.msk [vmem:[%s644_s25 + $0x7c] sm:$0xf] %vm374_vm0, %v373_v51 }
  0x3f PF: > { %s13_s12 = sadd.s32 1, %s569_s12  }
  0x40   : > { %p10_p4 = scmp.ge.s32.totalorder %s13_s12, 4  }
  0x42   :  { %12 = sbr.rel (!%p10_p4) target bundleno = 1 (0x1), region = 62 }

// kernel: bottleneck_forward.7
= control target key start
LH: loop header
LB: loop body
LE: loop exit
PB: predicated region body
PF: predicated region fallthrough
CT: control target
= control target key end

     0   :  { %s559_s12 = smov 0   ;;  %s738_s0 = inlined_call_operand.vmem [shape: bf16[512,8], index: 0, kind: input, shape index: {}]   ;;  %s739_s1 = inlined_call_operand.vmem [shape: f32[1,8], index: 1, kind: input, shape index: {}]   ;;  %s740_s2 = inlined_call_operand.vmem [shape: f32[1,8], index: 2, kind: input, shape index: {}]   ;;  %s741_s3 = inlined_call_operand.vmem [shape: f32[512,8], index: 3, kind: output, shape index: {}]  }
   0x1 LB: > { %s431_s13 = sadd.s32 4294967295, %s537_s12   ;;  %p435_p0 = scmp.ge.s32.totalorder %s537_s12, 1  ;;  %s537_s12 = sphi %s559_s12, %s13_s12  }
   0x2   : > { %p138_p1 = scmp.lt.s32.totalorder %s537_s12, 3 }
   0x4   : > { %p139_p2 = pnand %p435_p0, %p138_p1 }
   0x5   : > { %s436_s14 = sshll.u32 (!%p139_p2), %s431_s13, 5 }
   0x6   : > { %142 = sbr.rel (%p139_p2) target bundleno = 55 (0x37), region = 32  ;;  %p163_p3 = scmp.lt.s32.totalorder (!%p139_p2), %s436_s14, 63 }
   0xb   : > { %s743_s14 = smov (!%p163_p3, %s436_s14), 63  ;;  %v578_v0 = vld [vmem:[%s739_s1] ss:$0 sm:$0xff]  ;;  %vm342_vm0 = vcmask 64512  }
   0xc   : > { %s437_s15 = sshll.u32 %s743_s14, 2  ;;  %v586_v5 = vld [vmem:[%s740_s2] ss:$0 sm:$0xff]  ;;  %s439_s23 = sshll.u32 %s743_s14, 3 }
   0xd   : > { %s573_s18 = scalar_lea.vmem %s738_s0, %s437_s15  ;;  %s605_s26 = scalar_lea.vmem %s741_s3, %s439_s23 }
   0xe   : > { %v443_v1 = vld [vmem:[%s573_s18] sm:$0xff]   ;;  %v506_v2 = vld [vmem:[%s573_s18 + $0x8] sm:$0xff]   ;;  %v507_v3 = vld [vmem:[%s573_s18 + $0x10] sm:$0xff]  }
   0xf   : > { %v444_v4 = vunpack.c.l.bf16 %v443_v1  ;;  %v445_v6 = vunpack.c.h.bf16 %v443_v1  ;;  %v448_v7 = vunpack.c.l.bf16 %v506_v2  ;;  %v449_v8 = vunpack.c.h.bf16 %v506_v2  ;;  %v508_v9 = vld [vmem:[%s573_s18 + $0x18] sm:$0xff]   ;;  %v509_v30 = vld [vmem:[%s573_s18 + $0x20] sm:$0xff]   ;;  %v510_v31 = vld [vmem:[%s573_s18 + $0x28] sm:$0xff]  }
  0x10   : > { %v452_v10 = vunpack.c.l.bf16 %v507_v3  ;;  %v453_v11 = vunpack.c.h.bf16 %v507_v3  ;;  %v456_v12 = vunpack.c.l.bf16 %v508_v9  ;;  %v457_v13 = vunpack.c.h.bf16 %v508_v9  ;;  %v511_v36 = vld [vmem:[%s573_s18 + $0x30] sm:$0xff]   ;;  %v512_v37 = vld [vmem:[%s573_s18 + $0x38] sm:$0xff]   ;;  %v513_v3 = vld [vmem:[%s573_s18 + $0x40] sm:$0xff]  }
  0x11   : > { %v242_v14 = vmul.f32 %v578_v0, %v444_v4  ;;  %v243_v15 = vmul.f32 %v578_v0, %v445_v6  ;;  %v244_v16 = vmul.f32 %v578_v0, %v448_v7  ;;  %v245_v17 = vmul.f32 %v578_v0, %v449_v8  ;;  %v514_v4 = vld [vmem:[%s573_s18 + $0x48] sm:$0xff]   ;;  %v515_v6 = vld [vmem:[%s573_s18 + $0x50] sm:$0xff]  }
  0x12   : > { %v246_v18 = vmul.f32 %v578_v0, %v452_v10  ;;  %v247_v19 = vmul.f32 %v578_v0, %v453_v11  ;;  %v248_v20 = vmul.f32 %v578_v0, %v456_v12  ;;  %v249_v21 = vmul.f32 %v578_v0, %v457_v13  ;;  %v516_v11 = vld [vmem:[%s573_s18 + $0x58] sm:$0xff]  }
  0x13   : > { %v278_v22 = vadd.f32 %v586_v5, %v242_v14  ;;  %v279_v23 = vadd.f32 %v586_v5, %v243_v15  ;;  %v280_v24 = vadd.f32 %v586_v5, %v244_v16  ;;  %v281_v25 = vadd.f32 %v586_v5, %v245_v17 }
  0x14   : > { %v282_v26 = vadd.f32 %v586_v5, %v246_v18  ;;  %v283_v27 = vadd.f32 %v586_v5, %v247_v19  ;;  %v284_v28 = vadd.f32 %v586_v5, %v248_v20  ;;  %v285_v29 = vadd.f32 %v586_v5, %v249_v21 }
  0x15   : > { %v310_v32 = vmax.f32 %v278_v22, 0.0  ;;  %v311_v33 = vmax.f32 %v279_v23, 0.0  ;;  %v312_v34 = vmax.f32 %v280_v24, 0.0  ;;  %v313_v35 = vmax.f32 %v281_v25, 0.0 }
  0x16   : > { %v314_v38 = vmax.f32 %v282_v26, 0.0  ;;  %v315_v39 = vmax.f32 %v283_v27, 0.0  ;;  %v316_v40 = vmax.f32 %v284_v28, 0.0  ;;  %v317_v41 = vmax.f32 %v285_v29, 0.0 }
  0x17   : > { %343 = vst.msk [vmem:[%s605_s26] sm:$0xff] %vm342_vm0, %v310_v32  ;;  %v460_v42 = vunpack.c.l.bf16 %v509_v30  ;;  %v461_v43 = vunpack.c.h.bf16 %v509_v30  ;;  %v464_v44 = vunpack.c.l.bf16 %v510_v31  ;;  %v465_v45 = vunpack.c.h.bf16 %v510_v31 }
  0x18   : > { %344 = vst.msk [vmem:[%s605_s26 + $0x8] sm:$0xff] %vm342_vm0, %v311_v33  ;;  %v468_v46 = vunpack.c.l.bf16 %v511_v36  ;;  %v469_v47 = vunpack.c.h.bf16 %v511_v36  ;;  %v472_v48 = vunpack.c.l.bf16 %v512_v37  ;;  %v473_v49 = vunpack.c.h.bf16 %v512_v37 }
  0x19   : > { %345 = vst.msk [vmem:[%s605_s26 + $0x10] sm:$0xff] %vm342_vm0, %v312_v34  ;;  %v250_v50 = vmul.f32 %v578_v0, %v460_v42  ;;  %v251_v51 = vmul.f32 %v578_v0, %v461_v43  ;;  %v252_v52 = vmul.f32 %v578_v0, %v464_v44  ;;  %v253_v53 = vmul.f32 %v578_v0, %v465_v45  ;;  %v519_v42 = vld [vmem:[%s573_s18 + $0x70] sm:$0xff]  }
  0x1a   : > { %346 = vst.msk [vmem:[%s605_s26 + $0x18] sm:$0xff] %vm342_vm0, %v313_v35  ;;  %v254_v54 = vmul.f32 %v578_v0, %v468_v46  ;;  %v255_v55 = vmul.f32 %v578_v0, %v469_v47  ;;  %v256_v56 = vmul.f32 %v578_v0, %v472_v48  ;;  %v257_v57 = vmul.f32 %v578_v0, %v473_v49  ;;  %v520_v47 = vld [vmem:[%s573_s18 + $0x78] sm:$0xff]  }
  0x1b   : > { %347 = vst.msk [vmem:[%s605_s26 + $0x20] sm:$0xff] %vm342_vm0, %v314_v38  ;;  %v286_v58 = vadd.f32 %v586_v5, %v250_v50  ;;  %v287_v59 = vadd.f32 %v586_v5, %v251_v51  ;;  %v288_v60 = vadd.f32 %v586_v5, %v252_v52  ;;  %v289_v61 = vadd.f32 %v586_v5, %v253_v53 }
  0x1c   : > { %348 = vst.msk [vmem:[%s605_s26 + $0x28] sm:$0xff] %vm342_vm0, %v315_v39  ;;  %v290_v62 = vadd.f32 %v586_v5, %v254_v54  ;;  %v291_v63 = vadd.f32 %v586_v5, %v255_v55  ;;  %v292_v1 = vadd.f32 %v586_v5, %v256_v56  ;;  %v293_v2 = vadd.f32 %v586_v5, %v257_v57 }
  0x1d   : > { %349 = vst.msk [vmem:[%s605_s26 + $0x30] sm:$0xff] %vm342_vm0, %v316_v40  ;;  %v318_v7 = vmax.f32 %v286_v58, 0.0  ;;  %v319_v8 = vmax.f32 %v287_v59, 0.0  ;;  %v320_v9 = vmax.f32 %v288_v60, 0.0  ;;  %v321_v10 = vmax.f32 %v289_v61, 0.0  ;;  %v517_v40 = vld [vmem:[%s573_s18 + $0x60] sm:$0xff]  }
  0x1e   : > { %350 = vst.msk [vmem:[%s605_s26 + $0x38] sm:$0xff] %vm342_vm0, %v317_v41  ;;  %v322_v12 = vmax.f32 %v290_v62, 0.0  ;;  %v323_v13 = vmax.f32 %v291_v63, 0.0  ;;  %v324_v14 = vmax.f32 %v292_v1, 0.0  ;;  %v325_v15 = vmax.f32 %v293_v2, 0.0  ;;  %v518_v41 = vld [vmem:[%s573_s18 + $0x68] sm:$0xff]  }
  0x1f   : > { %351 = vst.msk [vmem:[%s605_s26 + $0x40] sm:$0xff] %vm342_vm0, %v318_v7  ;;  %v476_v16 = vunpack.c.l.bf16 %v513_v3  ;;  %v477_v17 = vunpack.c.h.bf16 %v513_v3  ;;  %v480_v18 = vunpack.c.l.bf16 %v514_v4  ;;  %v481_v19 = vunpack.c.h.bf16 %v514_v4 }
  0x20   : > { %352 = vst.msk [vmem:[%s605_s26 + $0x48] sm:$0xff] %vm342_vm0, %v319_v8  ;;  %v484_v20 = vunpack.c.l.bf16 %v515_v6  ;;  %v485_v21 = vunpack.c.h.bf16 %v515_v6  ;;  %v488_v22 = vunpack.c.l.bf16 %v516_v11  ;;  %v489_v23 = vunpack.c.h.bf16 %v516_v11 }
  0x21   : > { %353 = vst.msk [vmem:[%s605_s26 + $0x50] sm:$0xff] %vm342_vm0, %v320_v9  ;;  %v258_v24 = vmul.f32 %v578_v0, %v476_v16  ;;  %v259_v25 = vmul.f32 %v578_v0, %v477_v17  ;;  %v260_v26 = vmul.f32 %v578_v0, %v480_v18  ;;  %v261_v27 = vmul.f32 %v578_v0, %v481_v19 }
  0x22   : > { %354 = vst.msk [vmem:[%s605_s26 + $0x58] sm:$0xff] %vm342_vm0, %v321_v10  ;;  %v262_v28 = vmul.f32 %v578_v0, %v484_v20  ;;  %v263_v29 = vmul.f32 %v578_v0, %v485_v21  ;;  %v264_v30 = vmul.f32 %v578_v0, %v488_v22  ;;  %v265_v31 = vmul.f32 %v578_v0, %v489_v23 }
  0x23   : > { %355 = vst.msk [vmem:[%s605_s26 + $0x60] sm:$0xff] %vm342_vm0, %v322_v12  ;;  %v294_v32 = vadd.f32 %v586_v5, %v258_v24  ;;  %v295_v33 = vadd.f32 %v586_v5, %v259_v25  ;;  %v296_v34 = vadd.f32 %v586_v5, %v260_v26  ;;  %v297_v35 = vadd.f32 %v586_v5, %v261_v27 }
  0x24   : > { %356 = vst.msk [vmem:[%s605_s26 + $0x68] sm:$0xff] %vm342_vm0, %v323_v13  ;;  %v298_v36 = vadd.f32 %v586_v5, %v262_v28  ;;  %v299_v37 = vadd.f32 %v586_v5, %v263_v29  ;;  %v300_v38 = vadd.f32 %v586_v5, %v264_v30  ;;  %v301_v39 = vadd.f32 %v586_v5, %v265_v31 }
  0x25   : > { %357 = vst.msk [vmem:[%s605_s26 + $0x70] sm:$0xff] %vm342_vm0, %v324_v14  ;;  %v326_v43 = vmax.f32 %v294_v32, 0.0  ;;  %v327_v44 = vmax.f32 %v295_v33, 0.0  ;;  %v328_v45 = vmax.f32 %v296_v34, 0.0  ;;  %v329_v46 = vmax.f32 %v297_v35, 0.0 }
  0x26   : > { %358 = vst.msk [vmem:[%s605_s26 + $0x78] sm:$0xff] %vm342_vm0, %v325_v15  ;;  %v330_v48 = vmax.f32 %v298_v36, 0.0  ;;  %v331_v49 = vmax.f32 %v299_v37, 0.0  ;;  %v332_v50 = vmax.f32 %v300_v38, 0.0  ;;  %v333_v51 = vmax.f32 %v301_v39, 0.0 }
  0x27   : > { %359 = vst.msk [vmem:[%s605_s26 + $0x80] sm:$0xff] %vm342_vm0, %v326_v43  ;;  %v492_v52 = vunpack.c.l.bf16 %v517_v40  ;;  %v493_v53 = vunpack.c.h.bf16 %v517_v40  ;;  %v496_v54 = vunpack.c.l.bf16 %v518_v41  ;;  %v497_v55 = vunpack.c.h.bf16 %v518_v41 }
  0x28   : > { %360 = vst.msk [vmem:[%s605_s26 + $0x88] sm:$0xff] %vm342_vm0, %v327_v44  ;;  %v500_v56 = vunpack.c.l.bf16 %v519_v42  ;;  %v501_v57 = vunpack.c.h.bf16 %v519_v42  ;;  %v504_v58 = vunpack.c.l.bf16 %v520_v47  ;;  %v505_v59 = vunpack.c.h.bf16 %v520_v47 }
  0x29   : > { %361 = vst.msk [vmem:[%s605_s26 + $0x90] sm:$0xff] %vm342_vm0, %v328_v45  ;;  %v266_v60 = vmul.f32 %v578_v0, %v492_v52  ;;  %v267_v61 = vmul.f32 %v578_v0, %v493_v53  ;;  %v268_v62 = vmul.f32 %v578_v0, %v496_v54  ;;  %v269_v63 = vmul.f32 %v578_v0, %v497_v55 }
  0x2a   : > { %362 = vst.msk [vmem:[%s605_s26 + $0x98] sm:$0xff] %vm342_vm0, %v329_v46  ;;  %v270_v1 = vmul.f32 %v578_v0, %v500_v56  ;;  %v271_v2 = vmul.f32 %v578_v0, %v501_v57  ;;  %v272_v3 = vmul.f32 %v578_v0, %v504_v58  ;;  %v273_v4 = vmul.f32 %v578_v0, %v505_v59 }
  0x2b   : > { %363 = vst.msk [vmem:[%s605_s26 + $0xa0] sm:$0xff] %vm342_vm0, %v330_v48  ;;  %v302_v6 = vadd.f32 %v586_v5, %v266_v60  ;;  %v303_v7 = vadd.f32 %v586_v5, %v267_v61  ;;  %v304_v8 = vadd.f32 %v586_v5, %v268_v62  ;;  %v305_v9 = vadd.f32 %v586_v5, %v269_v63 }
  0x2c   : > { %364 = vst.msk [vmem:[%s605_s26 + $0xa8] sm:$0xff] %vm342_vm0, %v331_v49  ;;  %v306_v10 = vadd.f32 %v586_v5, %v270_v1  ;;  %v307_v0 = vadd.f32 %v586_v5, %v271_v2  ;;  %v308_v14 = vadd.f32 %v586_v5, %v272_v3  ;;  %v309_v16 = vadd.f32 %v586_v5, %v273_v4 }
  0x2d   : > { %365 = vst.msk [vmem:[%s605_s26 + $0xb0] sm:$0xff] %vm342_vm0, %v332_v50  ;;  %v334_v11 = vmax.f32 %v302_v6, 0.0  ;;  %v335_v12 = vmax.f32 %v303_v7, 0.0  ;;  %v336_v13 = vmax.f32 %v304_v8, 0.0  ;;  %v337_v15 = vmax.f32 %v305_v9, 0.0 }
  0x2e   : > { %366 = vst.msk [vmem:[%s605_s26 + $0xb8] sm:$0xff] %vm342_vm0, %v333_v51  ;;  %v338_v17 = vmax.f32 %v306_v10, 0.0  ;;  %v339_v18 = vmax.f32 %v307_v0, 0.0  ;;  %v340_v19 = vmax.f32 %v308_v14, 0.0  ;;  %v341_v20 = vmax.f32 %v309_v16, 0.0 }
  0x2f   : > { %367 = vst.msk [vmem:[%s605_s26 + $0xc0] sm:$0xff] %vm342_vm0, %v334_v11 }
  0x30   : > { %368 = vst.msk [vmem:[%s605_s26 + $0xc8] sm:$0xff] %vm342_vm0, %v335_v12 }
  0x31   : > { %369 = vst.msk [vmem:[%s605_s26 + $0xd0] sm:$0xff] %vm342_vm0, %v336_v13 }
  0x32   : > { %370 = vst.msk [vmem:[%s605_s26 + $0xd8] sm:$0xff] %vm342_vm0, %v337_v15 }
  0x33   : > { %371 = vst.msk [vmem:[%s605_s26 + $0xe0] sm:$0xff] %vm342_vm0, %v338_v17 }
  0x34   : > { %372 = vst.msk [vmem:[%s605_s26 + $0xe8] sm:$0xff] %vm342_vm0, %v339_v18 }
  0x35   : > { %373 = vst.msk [vmem:[%s605_s26 + $0xf0] sm:$0xff] %vm342_vm0, %v340_v19 }
  0x36   : > { %374 = vst.msk [vmem:[%s605_s26 + $0xf8] sm:$0xff] %vm342_vm0, %v341_v20 }
  0x37 PF: > { %s13_s12 = sadd.s32 1, %s537_s12  }
  0x38   : > { %p10_p4 = scmp.ge.s32.totalorder %s13_s12, 4  }
  0x3a   :  { %12 = sbr.rel (!%p10_p4) target bundleno = 1 (0x1), region = 62 }

// kernel: bottleneck_forward.6
= control target key start
LH: loop header
LB: loop body
LE: loop exit
PB: predicated region body
PF: predicated region fallthrough
CT: control target
= control target key end

     0   :  { %s1054_s15 = smov 0   ;;  %s1438_s0 = inlined_call_operand.vmem [shape: bf16[512,72], index: 0, kind: input, shape index: {}]   ;;  %s1439_s1 = inlined_call_operand.vmem [shape: bf16[72,8], index: 1, kind: input, shape index: {}]   ;;  %s1440_s2 = inlined_call_operand.vmem [shape: bf16[512,8], index: 2, kind: output, shape index: {0}]   ;;  %s1441_s3 = inlined_call_operand.vmem [shape: f32[16,8], index: 3, kind: output, shape index: {1}]   ;;  %s1442_s4 = inlined_call_operand.vmem [shape: f32[16,8], index: 4, kind: output, shape index: {2}]  }
   0x1 LB: > { %s1060_s16 = sadd.s32 4294967295, %s1027_s15   ;;  %p873_p0 = scmp.ge.s32.totalorder %s1027_s15, 1  ;;  %s1027_s15 = sphi %s1054_s15, %s15_s15  }
   0x2   : > { %p168_p1 = scmp.lt.s32.totalorder %s1027_s15, 3 }
   0x4   : > { %p169_p2 = pnand %p873_p0, %p168_p1 }
   0x5   : > { %s874_s19 = sshll.u32 (!%p169_p2), %s1060_s16, 5  ;;  %p214_p4 = scmp.lt.s32.totalorder (!%p169_p2), %s1060_s16, 1 }
   0x6   : > { %172 = sbr.rel (%p169_p2) target bundleno = 284 (0x11c), region = 28  ;;  %p203_p3 = scmp.lt.s32.totalorder (!%p169_p2), %s874_s19, 63 }
   0xb   : > { %v263_v0 = vld [vmem:[%s1439_s1 + $0x20] sm:$0xf]  ;;  %vm420_vm0 = vcmask 1043456   ;;  %v997_v4 = vld [vmem:[%s1439_s1 + $0x18] sm:$0xff]  ;;  %v996_v5 = vld [vmem:[%s1439_s1 + $0x10] sm:$0xff]  ;;  %s1444_s19 = smov (!%p203_p3, %s874_s19), 63 }
   0xc   : > { %v361_v1 = vunpack.c.l.b16 %v263_v0  ;;  %v995_v6 = vld [vmem:[%s1439_s1 + $0x8] sm:$0xff]  ;;  %s875_s26 = sshll.u32 %s1444_s19, 2  ;;  %v994_v7 = vld [vmem:[%s1439_s1] sm:$0xff]  ;;  %vm371_vm1 = vcmask 588800   ;;  %vm545_vm2 = vcmask 60416   ;;  %vm578_vm3 = vcmask 64512  }
   0xd   : > { %s1088_s5 = scalar_lea.vmem %s1438_s0, %s875_s26  ;;  %s1127_s8 = scalar_lea.vmem %s1440_s2, %s875_s26 }
   0xe   : > { %v366_v2 = vpack.c.b16 %v361_v1, %v361_v1  ;;  %v978_v8 = vld [vmem:[%s1088_s5] sm:$0xff]  ;;  %v979_v12 = vld [vmem:[%s1088_s5 + $0x8] sm:$0xff]  ;;  %v980_v16 = vld [vmem:[%s1088_s5 + $0x10] sm:$0xff]  ;;  %s1446_s16 = smov (!%p214_p4, %s1060_s16), 1 }
   0xf   : > { %v982_v9 = vld [vmem:[%s1088_s5 + $0x20] sm:$0xff]  ;;  %v983_v13 = vld [vmem:[%s1088_s5 + $0x28] sm:$0xff]  ;;  %v984_v17 = vld [vmem:[%s1088_s5 + $0x30] sm:$0xff]  ;;  %s878_s9 = sshll.u32 %s1446_s16, 3 }
  0x10   : > { %v422_v3 = vsel %vm420_vm0, %v366_v2, 0  ;;  %v986_v10 = vld [vmem:[%s1088_s5 + $0x40] sm:$0xff]  ;;  %v987_v14 = vld [vmem:[%s1088_s5 + $0x48] sm:$0xff]  ;;  %v988_v18 = vld [vmem:[%s1088_s5 + $0x50] sm:$0xff]  ;;  %s217_s12 = scalar_lea.vmem %s1441_s3, %s878_s9  ;;  %s221_s17 = scalar_lea.vmem %s1442_s4, %s878_s9 }
  0x11   : > { %427 = vmatpush.bf16.msra.mxu0 %v422_v3  ;;  %998 = vmatpush.bf16.msra.mxu1 %v422_v3  ;;  %v990_v11 = vld [vmem:[%s1088_s5 + $0x60] sm:$0xff]  ;;  %v991_v15 = vld [vmem:[%s1088_s5 + $0x68] sm:$0xff]  ;;  %v992_v19 = vld [vmem:[%s1088_s5 + $0x70] sm:$0xff] }
  0x12   : > { %999 = vmatpush.bf16.msra.mxu2 %v422_v3  ;;  %1000 = vmatpush.bf16.msra.mxu3 %v422_v3  ;;  %v981_v20 = vld [vmem:[%s1088_s5 + $0x18] sm:$0xff] }
  0x13   : > { %v985_v21 = vld [vmem:[%s1088_s5 + $0x38] sm:$0xff] }
  0x14   : > { %v989_v22 = vld [vmem:[%s1088_s5 + $0x58] sm:$0xff] }
  0x15   : > { %428 = vmatpush.bf16.msra.mxu0 %v997_v4  ;;  %1001 = vmatpush.bf16.msra.mxu1 %v997_v4  ;;  %v993_v23 = vld [vmem:[%s1088_s5 + $0x78] sm:$0xff] }
  0x16   : > { %1002 = vmatpush.bf16.msra.mxu2 %v997_v4  ;;  %1003 = vmatpush.bf16.msra.mxu3 %v997_v4 }
  0x19   : > { %429 = vmatpush.bf16.msra.mxu0 %v996_v5  ;;  %1004 = vmatpush.bf16.msra.mxu1 %v996_v5 }
  0x1a   : > { %1005 = vmatpush.bf16.msra.mxu2 %v996_v5  ;;  %1006 = vmatpush.bf16.msra.mxu3 %v996_v5 }
  0x1d   : > { %430 = vmatpush.bf16.msra.mxu0 %v995_v6  ;;  %1007 = vmatpush.bf16.msra.mxu1 %v995_v6 }
  0x1e   : > { %1008 = vmatpush.bf16.msra.mxu2 %v995_v6  ;;  %1009 = vmatpush.bf16.msra.mxu3 %v995_v6 }
  0x21   : > { %431 = vmatpush.bf16.msra.mxu0 %v994_v7  ;;  %1010 = vmatpush.bf16.msra.mxu1 %v994_v7 }
  0x22   : > { %1011 = vmatpush.bf16.msra.mxu2 %v994_v7  ;;  %1012 = vmatpush.bf16.msra.mxu3 %v994_v7 }
  0x24   : > { %960 = vmatmul.msk.bf16.vlgmr.msra.gmra.mxu0 %vm371_vm1, %v978_v8  ;;  %964 = vmatmul.msk.bf16.vlgmr.msra.gmra.mxu1 %vm371_vm1, %v982_v9 }
  0x25   : > { %968 = vmatmul.msk.bf16.vlgmr.msra.gmra.mxu2 %vm371_vm1, %v986_v10  ;;  %972 = vmatmul.msk.bf16.vlgmr.msra.gmra.mxu3 %vm371_vm1, %v990_v11 }
  0x34   : > { %961 = vmatmul.msk.bf16.gmra.mxu0 %vm371_vm1, %v979_v12  ;;  %965 = vmatmul.msk.bf16.gmra.mxu1 %vm371_vm1, %v983_v13 }
  0x35   : > { %969 = vmatmul.msk.bf16.gmra.mxu2 %vm371_vm1, %v987_v14  ;;  %973 = vmatmul.msk.bf16.gmra.mxu3 %vm371_vm1, %v991_v15 }
  0x44   : > { %962 = vmatmul.msk.bf16.gmra.mxu0 %vm371_vm1, %v980_v16  ;;  %966 = vmatmul.msk.bf16.gmra.mxu1 %vm371_vm1, %v984_v17 }
  0x45   : > { %970 = vmatmul.msk.bf16.gmra.mxu2 %vm371_vm1, %v988_v18  ;;  %974 = vmatmul.msk.bf16.gmra.mxu3 %vm371_vm1, %v992_v19 }
  0x54   : > { %963 = vmatmul.msk.bf16.gmra.mxu0 %vm371_vm1, %v981_v20  ;;  %967 = vmatmul.msk.bf16.gmra.mxu1 %vm371_vm1, %v985_v21 }
  0x55   : > { %971 = vmatmul.msk.bf16.gmra.mxu2 %vm371_vm1, %v989_v22  ;;  %975 = vmatmul.msk.bf16.gmra.mxu3 %vm371_vm1, %v993_v23 }
  0xa1   : > { %v1129_v24 = vpop.f32.mrf.mxu0  ;;  %v1131_v25 = vpop.f32.mrf.mxu1 }
  0xa2   : > { %v513_v26 = vpack.c.bf16 %v1129_v24, %v1129_v24  ;;  %v521_v27 = vpack.c.bf16 %v1131_v25, %v1131_v25  ;;  %v648_v4 = vmul.f32 %v1129_v24, %v1129_v24  ;;  %v579_v8 = vsel %vm578_vm3, %v1129_v24, 0.0 }
  0xa4   : > { %546 = vst.msk [vmem:[%s1127_s8] sm:$0xf] %vm545_vm2, %v513_v26  ;;  %v680_v12 = vsel %vm578_vm3, %v648_v4, 0.0 }
  0xa5   : > { %554 = vst.msk [vmem:[%s1127_s8 + $0x20] sm:$0xf] %vm545_vm2, %v521_v27 }
  0xa8   : > { %v1141_v28 = vpop.f32.mrf.mxu2  ;;  %v1149_v34 = vpop.f32.mrf.mxu3 }
  0xa9   : > { %v435_v29 = vpop.f32.mrf.mxu0  ;;  %v1143_v30 = vpop.f32.mrf.mxu1  ;;  %v529_v31 = vpack.c.bf16 %v1141_v28, %v1141_v28  ;;  %v537_v35 = vpack.c.bf16 %v1149_v34, %v1149_v34 }
  0xaa   : > { %v514_v32 = vpack.c.bf16 %v435_v29, %v435_v29  ;;  %v522_v33 = vpack.c.bf16 %v1143_v30, %v1143_v30  ;;  %v649_v0 = vmul.f32 %v435_v29, %v435_v29  ;;  %v580_v5 = vsel %vm578_vm3, %v435_v29, 0.0 }
  0xab   : > { %562 = vst.msk [vmem:[%s1127_s8 + $0x40] sm:$0xf] %vm545_vm2, %v529_v31  ;;  %v581_v11 = vadd.f32 %v580_v5, %v579_v8  ;;  %v594_v8 = vsel %vm578_vm3, %v1131_v25, 0.0 }
  0xac   : > { %547 = vst.msk [vmem:[%s1127_s8 + $0x4] sm:$0xf] %vm545_vm2, %v514_v32  ;;  %v681_v9 = vsel %vm578_vm3, %v649_v0, 0.0 }
  0xad   : > { %555 = vst.msk [vmem:[%s1127_s8 + $0x24] sm:$0xf] %vm545_vm2, %v522_v33  ;;  %v682_v17 = vadd.f32 %v681_v9, %v680_v12  ;;  %v657_v9 = vmul.f32 %v1143_v30, %v1143_v30 }
  0xae   : > { %570 = vst.msk [vmem:[%s1127_s8 + $0x60] sm:$0xf] %vm545_vm2, %v537_v35 }
  0xb0   : > { %v1161_v36 = vpop.f32.mrf.mxu2  ;;  %v1169_v42 = vpop.f32.mrf.mxu3 }
  0xb1   : > { %v438_v37 = vpop.f32.mrf.mxu0  ;;  %v1163_v38 = vpop.f32.mrf.mxu1  ;;  %v530_v39 = vpack.c.bf16 %v1161_v36, %v1161_v36  ;;  %v538_v43 = vpack.c.bf16 %v1169_v42, %v1169_v42 }
  0xb2   : > { %v515_v40 = vpack.c.bf16 %v438_v37, %v438_v37  ;;  %v523_v41 = vpack.c.bf16 %v1163_v38, %v1163_v38  ;;  %v650_v6 = vmul.f32 %v438_v37, %v438_v37  ;;  %v582_v10 = vsel %vm578_vm3, %v438_v37, 0.0 }
  0xb3   : > { %563 = vst.msk [vmem:[%s1127_s8 + $0x44] sm:$0xf] %vm545_vm2, %v530_v39  ;;  %v583_v18 = vadd.f32 %v582_v10, %v581_v11 }
  0xb4   : > { %548 = vst.msk [vmem:[%s1127_s8 + $0x8] sm:$0xf] %vm545_vm2, %v515_v40  ;;  %v683_v13 = vsel %vm578_vm3, %v650_v6, 0.0 }
  0xb5   : > { %556 = vst.msk [vmem:[%s1127_s8 + $0x28] sm:$0xf] %vm545_vm2, %v523_v41  ;;  %v684_v31 = vadd.f32 %v683_v13, %v682_v17 }
  0xb6   : > { %571 = vst.msk [vmem:[%s1127_s8 + $0x64] sm:$0xf] %vm545_vm2, %v538_v43 }
  0xb8   : > { %v1181_v44 = vpop.f32.mrf.mxu2  ;;  %v1189_v50 = vpop.f32.mrf.mxu3 }
  0xb9   : > { %v440_v45 = vpop.f32.mrf.mxu0  ;;  %v1183_v46 = vpop.f32.mrf.mxu1  ;;  %v531_v47 = vpack.c.bf16 %v1181_v44, %v1181_v44  ;;  %v539_v58 = vpack.c.bf16 %v1189_v50, %v1189_v50 }
  0xba   : > { %v516_v48 = vpack.c.bf16 %v440_v45, %v440_v45  ;;  %v524_v49 = vpack.c.bf16 %v1183_v46, %v1183_v46  ;;  %v651_v7 = vmul.f32 %v440_v45, %v440_v45  ;;  %v584_v14 = vsel %vm578_vm3, %v440_v45, 0.0 }
  0xbb   : > { %564 = vst.msk [vmem:[%s1127_s8 + $0x48] sm:$0xf] %vm545_vm2, %v531_v47  ;;  %v585_v32 = vadd.f32 %v584_v14, %v583_v18  ;;  %v596_v14 = vsel %vm578_vm3, %v1143_v30, 0.0  ;;  %v697_v18 = vsel %vm578_vm3, %v657_v9, 0.0 }
  0xbc   : > { %549 = vst.msk [vmem:[%s1127_s8 + $0xc] sm:$0xf] %vm545_vm2, %v516_v48  ;;  %v685_v19 = vsel %vm578_vm3, %v651_v7, 0.0 }
  0xbd   : > { %557 = vst.msk [vmem:[%s1127_s8 + $0x2c] sm:$0xf] %vm545_vm2, %v524_v49  ;;  %v686_v40 = vadd.f32 %v685_v19, %v684_v31  ;;  %v598_v19 = vsel %vm578_vm3, %v1163_v38, 0.0 }
  0xbe   : > { %572 = vst.msk [vmem:[%s1127_s8 + $0x68] sm:$0xf] %vm545_vm2, %v539_v58 }
  0xc0   : > { %v1197_v51 = vpop.f32.mrf.mxu2  ;;  %v1205_v57 = vpop.f32.mrf.mxu3 }
  0xc1   : > { %v443_v52 = vpop.f32.mrf.mxu0  ;;  %v1199_v53 = vpop.f32.mrf.mxu1  ;;  %v532_v54 = vpack.c.bf16 %v1197_v51, %v1197_v51  ;;  %v540_v59 = vpack.c.bf16 %v1205_v57, %v1205_v57 }
  0xc2   : > { %v517_v55 = vpack.c.bf16 %v443_v52, %v443_v52  ;;  %v525_v56 = vpack.c.bf16 %v1199_v53, %v1199_v53  ;;  %v652_v15 = vmul.f32 %v443_v52, %v443_v52  ;;  %v586_v23 = vsel %vm578_vm3, %v443_v52, 0.0 }
  0xc3   : > { %565 = vst.msk [vmem:[%s1127_s8 + $0x4c] sm:$0xf] %vm545_vm2, %v532_v54  ;;  %v587_v41 = vadd.f32 %v586_v23, %v585_v32 }
  0xc4   : > { %550 = vst.msk [vmem:[%s1127_s8 + $0x10] sm:$0xf] %vm545_vm2, %v517_v55  ;;  %v687_v33 = vsel %vm578_vm3, %v652_v15, 0.0  ;;  %v656_v55 = vmul.f32 %v1131_v25, %v1131_v25  ;;  %v658_v15 = vmul.f32 %v1163_v38, %v1163_v38  ;;  %v660_v38 = vmul.f32 %v1199_v53, %v1199_v53 }
  0xc5   : > { %558 = vst.msk [vmem:[%s1127_s8 + $0x30] sm:$0xf] %vm545_vm2, %v525_v56  ;;  %v688_v48 = vadd.f32 %v687_v33, %v686_v40 }
  0xc6   : > { %573 = vst.msk [vmem:[%s1127_s8 + $0x6c] sm:$0xf] %vm545_vm2, %v540_v59  ;;  %v695_v13 = vsel %vm578_vm3, %v656_v55, 0.0 }
  0xc8   : > { %v1221_v60 = vpop.f32.mrf.mxu2  ;;  %v1229_v3 = vpop.f32.mrf.mxu3 }
  0xc9   : > { %v445_v61 = vpop.f32.mrf.mxu0  ;;  %v1223_v62 = vpop.f32.mrf.mxu1  ;;  %v533_v63 = vpack.c.bf16 %v1221_v60, %v1221_v60  ;;  %v541_v39 = vpack.c.bf16 %v1229_v3, %v1229_v3 }
  0xca   : > { %v518_v1 = vpack.c.bf16 %v445_v61, %v445_v61  ;;  %v526_v2 = vpack.c.bf16 %v1223_v62, %v1223_v62  ;;  %v653_v24 = vmul.f32 %v445_v61, %v445_v61  ;;  %v588_v35 = vsel %vm578_vm3, %v445_v61, 0.0 }
  0xcb   : > { %566 = vst.msk [vmem:[%s1127_s8 + $0x50] sm:$0xf] %vm545_vm2, %v533_v63  ;;  %v589_v49 = vadd.f32 %v588_v35, %v587_v41  ;;  %v661_v40 = vmul.f32 %v1223_v62, %v1223_v62 }
  0xcc   : > { %551 = vst.msk [vmem:[%s1127_s8 + $0x14] sm:$0xf] %vm545_vm2, %v518_v1  ;;  %v689_v45 = vsel %vm578_vm3, %v653_v24, 0.0 }
  0xcd   : > { %559 = vst.msk [vmem:[%s1127_s8 + $0x34] sm:$0xf] %vm545_vm2, %v526_v2  ;;  %v690_v56 = vadd.f32 %v689_v45, %v688_v48  ;;  %v703_v45 = vsel %vm578_vm3, %v660_v38, 0.0 }
  0xce   : > { %574 = vst.msk [vmem:[%s1127_s8 + $0x70] sm:$0xf] %vm545_vm2, %v541_v39 }
  0xd0   : > { %v1247_v16 = vpop.f32.mrf.mxu2  ;;  %v1257_v29 = vpop.f32.mrf.mxu3 }
  0xd1   : > { %v448_v20 = vpop.f32.mrf.mxu0  ;;  %v1250_v21 = vpop.f32.mrf.mxu1  ;;  %v534_v22 = vpack.c.bf16 %v1247_v16, %v1247_v16  ;;  %v542_v43 = vpack.c.bf16 %v1257_v29, %v1257_v29 }
  0xd2   : > { %v519_v26 = vpack.c.bf16 %v448_v20, %v448_v20  ;;  %v527_v27 = vpack.c.bf16 %v1250_v21, %v1250_v21  ;;  %v654_v37 = vmul.f32 %v448_v20, %v448_v20  ;;  %v590_v47 = vsel %vm578_vm3, %v448_v20, 0.0 }
  0xd3   : > { %567 = vst.msk [vmem:[%s1127_s8 + $0x54] sm:$0xf] %vm545_vm2, %v534_v22  ;;  %v591_v58 = vadd.f32 %v590_v47, %v589_v49  ;;  %v659_v20 = vmul.f32 %v1183_v46, %v1183_v46  ;;  %v604_v47 = vsel %vm578_vm3, %v1223_v62, 0.0  ;;  %v662_v48 = vmul.f32 %v1250_v21, %v1250_v21 }
  0xd4   : > { %552 = vst.msk [vmem:[%s1127_s8 + $0x18] sm:$0xf] %vm545_vm2, %v519_v26  ;;  %v691_v52 = vsel %vm578_vm3, %v654_v37, 0.0  ;;  %v699_v26 = vsel %vm578_vm3, %v658_v15, 0.0  ;;  %v606_v55 = vsel %vm578_vm3, %v1250_v21, 0.0 }
  0xd5   : > { %560 = vst.msk [vmem:[%s1127_s8 + $0x38] sm:$0xf] %vm545_vm2, %v527_v27  ;;  %v692_v6 = vadd.f32 %v691_v52, %v690_v56  ;;  %v600_v27 = vsel %vm578_vm3, %v1183_v46, 0.0  ;;  %v701_v39 = vsel %vm578_vm3, %v659_v20, 0.0  ;;  %v602_v46 = vsel %vm578_vm3, %v1199_v53, 0.0 }
  0xd6   : > { %575 = vst.msk [vmem:[%s1127_s8 + $0x74] sm:$0xf] %vm545_vm2, %v542_v43  ;;  %v705_v53 = vsel %vm578_vm3, %v661_v40, 0.0  ;;  %v672_v40 = vmul.f32 %v1149_v34, %v1149_v34 }
  0xd8   : > { %v1278_v54 = vpop.f32.mrf.mxu2  ;;  %v1285_v5 = vpop.f32.mrf.mxu3 }
  0xd9   : > { %v450_v59 = vpop.f32.mrf.mxu0  ;;  %v470_v61 = vpop.f32.mrf.mxu1  ;;  %v535_v63 = vpack.c.bf16 %v1278_v54, %v1278_v54  ;;  %v543_v31 = vpack.c.bf16 %v1285_v5, %v1285_v5  ;;  %v670_v38 = vmul.f32 %v1278_v54, %v1278_v54 }
  0xda   : > { %v520_v0 = vpack.c.bf16 %v450_v59, %v450_v59  ;;  %v592_v1 = vsel %vm578_vm3, %v450_v59, 0.0  ;;  %v655_v2 = vmul.f32 %v450_v59, %v450_v59  ;;  %v528_v4 = vpack.c.bf16 %v470_v61, %v470_v61 }
  0xdb   : > { %v593_v7 = vadd.f32 %v592_v1, %v591_v58  ;;  %568 = vst.msk [vmem:[%s1127_s8 + $0x58] sm:$0xf] %vm545_vm2, %v535_v63  ;;  %v663_v56 = vmul.f32 %v470_v61, %v470_v61  ;;  %v664_v63 = vmul.f32 %v1141_v28, %v1141_v28  ;;  %v608_v62 = vsel %vm578_vm3, %v470_v61, 0.0 }
  0xdc   : > { %553 = vst.msk [vmem:[%s1127_s8 + $0x1c] sm:$0xf] %vm545_vm2, %v520_v0  ;;  %v693_v10 = vsel %vm578_vm3, %v655_v2, 0.0  ;;  %v707_v0 = vsel %vm578_vm3, %v662_v48, 0.0  ;;  %v666_v61 = vmul.f32 %v1181_v44, %v1181_v44 }
  0xdd   : > { %v595_v11 = vadd.f32 %v594_v8, %v593_v7  ;;  %v694_v12 = vadd.f32 %v693_v10, %v692_v6  ;;  %561 = vst.msk [vmem:[%s1127_s8 + $0x3c] sm:$0xf] %vm545_vm2, %v528_v4  ;;  %v610_v4 = vsel %vm578_vm3, %v1141_v28, 0.0  ;;  %v665_v6 = vmul.f32 %v1161_v36, %v1161_v36 }
  0xde   : > { %576 = vst.msk [vmem:[%s1127_s8 + $0x78] sm:$0xf] %vm545_vm2, %v543_v31  ;;  %v709_v21 = vsel %vm578_vm3, %v663_v56, 0.0  ;;  %v711_v9 = vsel %vm578_vm3, %v664_v63, 0.0  ;;  %v612_v10 = vsel %vm578_vm3, %v1161_v36, 0.0  ;;  %v614_v28 = vsel %vm578_vm3, %v1181_v44, 0.0 }
  0xdf   : > { %v597_v25 = vadd.f32 %v596_v14, %v595_v11  ;;  %v696_v17 = vadd.f32 %v695_v13, %v694_v12  ;;  %v713_v13 = vsel %vm578_vm3, %v665_v6, 0.0  ;;  %v667_v14 = vmul.f32 %v1197_v51, %v1197_v51 }
  0xe0   : > { %v1308_v22 = vpop.f32.mrf.mxu2  ;;  %v1319_v32 = vpop.f32.mrf.mxu3  ;;  %v616_v36 = vsel %vm578_vm3, %v1197_v51, 0.0  ;;  %v618_v44 = vsel %vm578_vm3, %v1221_v60, 0.0  ;;  %v620_v51 = vsel %vm578_vm3, %v1247_v16, 0.0  ;;  %v675_v63 = vmul.f32 %v1205_v57, %v1205_v57 }
  0xe1   : > { %v599_v23 = vadd.f32 %v598_v19, %v597_v25  ;;  %v698_v24 = vadd.f32 %v697_v18, %v696_v17  ;;  %v536_v30 = vpack.c.bf16 %v1308_v22, %v1308_v22  ;;  %v544_v37 = vpack.c.bf16 %v1319_v32, %v1319_v32 }
  0xe2   : > { %v715_v17 = vsel %vm578_vm3, %v666_v61, 0.0  ;;  %v668_v18 = vmul.f32 %v1221_v60, %v1221_v60  ;;  %v622_v60 = vsel %vm578_vm3, %v1278_v54, 0.0  ;;  %v673_v54 = vmul.f32 %v1169_v42, %v1169_v42 }
  0xe3   : > { %v700_v33 = vadd.f32 %v699_v26, %v698_v24  ;;  %v601_v35 = vadd.f32 %v600_v27, %v599_v23  ;;  %569 = vst.msk [vmem:[%s1127_s8 + $0x5c] sm:$0xf] %vm545_vm2, %v536_v30  ;;  %v717_v23 = vsel %vm578_vm3, %v667_v14, 0.0  ;;  %v669_v24 = vmul.f32 %v1247_v16, %v1247_v16 }
  0xe4   : > { %577 = vst.msk [vmem:[%s1127_s8 + $0x7c] sm:$0xf] %vm545_vm2, %v544_v37  ;;  %v719_v27 = vsel %vm578_vm3, %v668_v18, 0.0  ;;  %v671_v37 = vmul.f32 %v1308_v22, %v1308_v22  ;;  %v723_v16 = vsel %vm578_vm3, %v670_v38, 0.0  ;;  %v678_v61 = vmul.f32 %v1285_v5, %v1285_v5 }
  0xe5   : > { %v603_v41 = vadd.f32 %v602_v46, %v601_v35  ;;  %v702_v43 = vadd.f32 %v701_v39, %v700_v33  ;;  %v721_v35 = vsel %vm578_vm3, %v669_v24, 0.0 }
  0xe6   : > { %v725_v48 = vsel %vm578_vm3, %v671_v37, 0.0 }
  0xe7   : > { %v605_v49 = vadd.f32 %v604_v47, %v603_v41  ;;  %v704_v52 = vadd.f32 %v703_v45, %v702_v43  ;;  %v624_v41 = vsel %vm578_vm3, %v1308_v22, 0.0  ;;  %v626_v47 = vsel %vm578_vm3, %v1149_v34, 0.0 }
  0xe8   : > { %v674_v22 = vmul.f32 %v1189_v50, %v1189_v50  ;;  %v630_v34 = vsel %vm578_vm3, %v1189_v50, 0.0  ;;  %v634_v50 = vsel %vm578_vm3, %v1229_v3, 0.0 }
  0xe9   : > { %v607_v58 = vadd.f32 %v606_v55, %v605_v49  ;;  %v706_v59 = vadd.f32 %v705_v53, %v704_v52  ;;  %v727_v53 = vsel %vm578_vm3, %v672_v40, 0.0  ;;  %v628_v55 = vsel %vm578_vm3, %v1169_v42, 0.0 }
  0xea   : > { %v632_v42 = vsel %vm578_vm3, %v1205_v57, 0.0  ;;  %v636_v57 = vsel %vm578_vm3, %v1257_v29, 0.0 }
  0xeb   : > { %v708_v1 = vadd.f32 %v707_v0, %v706_v59  ;;  %v609_v2 = vadd.f32 %v608_v62, %v607_v58  ;;  %v729_v59 = vsel %vm578_vm3, %v673_v54, 0.0 }
  0xed   : > { %v611_v7 = vadd.f32 %v610_v4, %v609_v2  ;;  %v710_v8 = vadd.f32 %v709_v21, %v708_v1  ;;  %v731_v1 = vsel %vm578_vm3, %v674_v22, 0.0  ;;  %v676_v2 = vmul.f32 %v1229_v3, %v1229_v3 }
  0xee   : > { %v733_v21 = vsel %vm578_vm3, %v675_v63, 0.0  ;;  %v638_v3 = vsel %vm578_vm3, %v1285_v5, 0.0 }
  0xef   : > { %v613_v11 = vadd.f32 %v612_v10, %v611_v7  ;;  %v712_v12 = vadd.f32 %v711_v9, %v710_v8  ;;  %v677_v7 = vmul.f32 %v1257_v29, %v1257_v29  ;;  %v735_v10 = vsel %vm578_vm3, %v676_v2, 0.0 }
  0xf0   : > { %v640_v29 = vsel %vm578_vm3, %v1319_v32, 0.0 }
  0xf1   : > { %v615_v15 = vadd.f32 %v614_v28, %v613_v11  ;;  %v714_v25 = vadd.f32 %v713_v13, %v712_v12  ;;  %v737_v13 = vsel %vm578_vm3, %v677_v7, 0.0  ;;  %v679_v28 = vmul.f32 %v1319_v32, %v1319_v32 }
  0xf3   : > { %v716_v19 = vadd.f32 %v715_v17, %v714_v25  ;;  %v617_v20 = vadd.f32 %v616_v36, %v615_v15  ;;  %v739_v25 = vsel %vm578_vm3, %v678_v61, 0.0  ;;  %v741_v18 = vsel %vm578_vm3, %v679_v28, 0.0 }
  0xf5   : > { %v619_v30 = vadd.f32 %v618_v44, %v617_v20  ;;  %v718_v26 = vadd.f32 %v717_v23, %v716_v19 }
  0xf7   : > { %v621_v31 = vadd.f32 %v620_v51, %v619_v30  ;;  %v720_v33 = vadd.f32 %v719_v27, %v718_v26 }
  0xf9   : > { %v722_v39 = vadd.f32 %v721_v35, %v720_v33  ;;  %v623_v46 = vadd.f32 %v622_v60, %v621_v31 }
  0xfb   : > { %v724_v43 = vadd.f32 %v723_v16, %v722_v39  ;;  %v625_v45 = vadd.f32 %v624_v41, %v623_v46 }
  0xfd   : > { %v627_v49 = vadd.f32 %v626_v47, %v625_v45  ;;  %v726_v52 = vadd.f32 %v725_v48, %v724_v43 }
  0xff   : > { %v629_v56 = vadd.f32 %v628_v55, %v627_v49  ;;  %v728_v58 = vadd.f32 %v727_v53, %v726_v52 }
 0x101   : > { %v631_v0 = vadd.f32 %v630_v34, %v629_v56  ;;  %v730_v62 = vadd.f32 %v729_v59, %v728_v58 }
 0x103   : > { %v732_v4 = vadd.f32 %v731_v1, %v730_v62  ;;  %v633_v6 = vadd.f32 %v632_v42, %v631_v0 }
 0x105   : > { %v635_v8 = vadd.f32 %v634_v50, %v633_v6  ;;  %v734_v9 = vadd.f32 %v733_v21, %v732_v4 }
 0x107   : > { %v637_v11 = vadd.f32 %v636_v57, %v635_v8  ;;  %v736_v12 = vadd.f32 %v735_v10, %v734_v9 }
 0x109   : > { %v738_v14 = vadd.f32 %v737_v13, %v736_v12  ;;  %v639_v15 = vadd.f32 %v638_v3, %v637_v11 }
 0x10b   : > { %v740_v17 = vadd.f32 %v739_v25, %v738_v14  ;;  %v641_v36 = vadd.f32 %v640_v29, %v639_v15 }
 0x10d   : > { %v642_v19 = vrot.slane %v641_v36, 4  ;;  %v742_v20 = vadd.f32 %v741_v18, %v740_v17 }
 0x10f   : > { %v643_v23 = vadd.f32 %v642_v19, %v641_v36  ;;  %v743_v5 = vrot.slane %v742_v20, 4 }
 0x111   : > { %v644_v44 = vrot.slane %v643_v23, 2  ;;  %v744_v24 = vadd.f32 %v743_v5, %v742_v20 }
 0x113   : > { %v645_v30 = vadd.f32 %v644_v44, %v643_v23  ;;  %v745_v26 = vrot.slane %v744_v24, 2 }
 0x115   : > { %v646_v27 = vrot.slane %v645_v30, 1  ;;  %v746_v51 = vadd.f32 %v745_v26, %v744_v24 }
 0x117   : > { %v647_v32 = vadd.f32 %v646_v27, %v645_v30  ;;  %v747_v38 = vrot.slane %v746_v51, 1 }
 0x119   : > { %v748_v31 = vadd.f32 %v747_v38, %v746_v51  ;;  %749 = vst.msk [vmem:[%s217_s12] sm:$0xff] %vm578_vm3, %v647_v32 }
 0x11b   : > { %750 = vst.msk [vmem:[%s221_s17] sm:$0xff] %vm578_vm3, %v748_v31 }
 0x11c PF: > { %s15_s15 = sadd.s32 1, %s1027_s15  }
 0x11d   : > { %p12_p5 = scmp.ge.s32.totalorder %s15_s15, 4  }
 0x11f   :  { %14 = sbr.rel (!%p12_p5) target bundleno = 1 (0x1), region = 82 }

</bundles_post_ra>
